<compile_context>
chip_gen: v7x
topology: tpu7x:2x2x1
jax: 0.10.0
libtpu: 0.0.40
codegen_flags: <defaults>
</compile_context>

<pallas_src>
import functools

import jax
import jax.numpy as jnp
from jax import lax
from jax.experimental import pallas as pl
from jax.experimental.pallas import tpu as pltpu


# ----------------------------------------------------------------------------
# kernel: fused multi-head self-attention for one batch element
# ----------------------------------------------------------------------------
def _attention_kernel(x_ref, wqkv_ref, wo_ref, bo_ref, o_ref, *, num_heads, scale):
    # x_ref:(N,C)  wqkv_ref:(C,3C)  wo_ref:(C,C)  bo_ref:(1,C)  o_ref:(N,C)
    x = x_ref[...]
    C = x.shape[-1]
    hd = C // num_heads

    # Single fused qkv matmul (qkv_bias=False).  Output is 3C lanes wide.
    qkv = jnp.dot(x, wqkv_ref[...], preferred_element_type=jnp.float32)
    q = qkv[:, 0 * C:1 * C] * scale          # fold the attention scale into q
    k = qkv[:, 1 * C:2 * C]
    v = qkv[:, 2 * C:3 * C]

    # Per-head attention; heads fully unrolled (small H -> one basic block).
    # TODO(synk): fold the head loop into one leading-batch-dim einsum via a
    #             pltpu.einshape relayout once verified on the target Mosaic.
    head_outs = []
    for h in range(num_heads):
        lo = h * hd
        qh = q[:, lo:lo + hd]
        kh = k[:, lo:lo + hd]
        vh = v[:, lo:lo + hd]
        s = lax.dot_general(qh, kh, (((1,), (1,)), ((), ())),
                            preferred_element_type=jnp.float32)          # (N, N)
        s = s - jnp.max(s, axis=-1, keepdims=True)
        e = jnp.exp(s)
        inv = pl.reciprocal(jnp.sum(e, axis=-1, keepdims=True), approx=True)
        p = e * inv
        head_outs.append(jnp.dot(p, vh, preferred_element_type=jnp.float32))

    # Lane-concatenate heads -> one (N,C)@(C,C) projection + bias.
    o = jnp.concatenate(head_outs, axis=-1)                               # (N, C)
    o_ref[...] = (jnp.dot(o, wo_ref[...], preferred_element_type=jnp.float32)
                  + bo_ref[...])


# ----------------------------------------------------------------------------
# wrapper
# ----------------------------------------------------------------------------
def attention_forward(x, wqkv, wo, bo, *, num_heads):
    B, N, C = x.shape
    assert C % num_heads == 0
    hd = C // num_heads
    scale = float(hd) ** (-0.5)
    kernel = functools.partial(_attention_kernel, num_heads=num_heads, scale=scale)

    def batched(shape):
        nd = len(shape)
        return pl.BlockSpec((None,) + tuple(int(s) for s in shape[1:]),
                            lambda b, _nd=nd: (b,) + (0,) * (_nd - 1))

    def shared(shape):
        nd = len(shape)
        return pl.BlockSpec(tuple(int(s) for s in shape),
                            lambda b, _nd=nd: (0,) * _nd)

    return pl.pallas_call(
        kernel,
        grid=(B,),
        in_specs=[batched(x.shape), shared(wqkv.shape),
                  shared(wo.shape), shared(bo.shape)],
        out_specs=batched((B, N, C)),
        out_shape=jax.ShapeDtypeStruct((B, N, C), jnp.float32),
        compiler_params=pltpu.CompilerParams(
            dimension_semantics=("parallel",)),   # batch -> both TCs on v7x
    )(x, wqkv, wo, bo)


# ----------------------------------------------------------------------------
# pure-JAX reference (matches the PyTorch module forward)
# ----------------------------------------------------------------------------
def attention_reference(x, wqkv, wo, bo, *, num_heads):
    B, N, C = x.shape
    hd = C // num_heads
    scale = float(hd) ** (-0.5)
    qkv = jnp.einsum("bnc,ce->bne", x, wqkv).reshape(B, N, 3, num_heads, hd)
    qkv = jnp.transpose(qkv, (2, 0, 3, 1, 4))
    q, k, v = qkv[0], qkv[1], qkv[2]
    attn = jnp.einsum("bhnd,bhmd->bhnm", q, k) * scale
    attn = jax.nn.softmax(attn, axis=-1)
    o = jnp.einsum("bhnm,bhmd->bhnd", attn, v)
    o = jnp.transpose(o, (0, 2, 1, 3)).reshape(B, N, C)
    return jnp.einsum("bnc,cd->bnd", o, wo) + bo


if __name__ == "__main__":
    B, N, dim, num_heads = 2, 16, 128, 8

    key = jax.random.PRNGKey(0)
    kx, kq, ko, kb = jax.random.split(key, 4)
    x = jax.random.normal(kx, (B, N, dim), jnp.float32)
    wqkv = 0.02 * jax.random.normal(kq, (dim, 3 * dim), jnp.float32)
    wo = 0.02 * jax.random.normal(ko, (dim, dim), jnp.float32)
    bo = 0.02 * jax.random.normal(kb, (1, dim), jnp.float32)

    out = attention_forward(x, wqkv, wo, bo, num_heads=num_heads)
    out = jax.block_until_ready(out)

    ref = attention_reference(x, wqkv, wo, bo, num_heads=num_heads)
    assert out.shape == (B, N, dim)
    assert bool(jnp.all(jnp.isfinite(out)))
    # approx=True softmax reciprocal -> ~1e-3 relative; loose tolerance.
    assert bool(jnp.allclose(out, ref, rtol=5e-2, atol=5e-3))
    print("KERNEL_OK")
</pallas_src>

<mosaic_0001>
module attributes {stable_mosaic.version = 11 : i64} {
  func.func @_attention_kernel(%arg0: i32, %arg1: memref<1x16x128xf32, #tpu.memory_space<vmem>>, %arg2: memref<128x384xf32, #tpu.memory_space<vmem>>, %arg3: memref<128x128xf32, #tpu.memory_space<vmem>>, %arg4: memref<1x128xf32, #tpu.memory_space<vmem>>, %arg5: memref<1x16x128xf32, #tpu.memory_space<vmem>>) attributes {dimension_semantics = [#tpu.dimension_semantics<parallel>], iteration_bounds = array<i64: 2>, scalar_prefetch = 0 : i64, scratch_operands = 0 : i64, tpu.core_type = #tpu.core_type<tc>, window_params = [{transform_indices = @transform_0, window_bounds = array<i64: 1, 16, 128>}, {pipeline_mode = #tpu.pipeline_mode<synchronous>, transform_indices = @transform_1, window_bounds = array<i64: 128, 384>}, {pipeline_mode = #tpu.pipeline_mode<synchronous>, transform_indices = @transform_2, window_bounds = array<i64: 128, 128>}, {pipeline_mode = #tpu.pipeline_mode<synchronous>, transform_indices = @transform_3, window_bounds = array<i64: 1, 128>}, {transform_indices = @transform_4, window_bounds = array<i64: 1, 16, 128>}]} {
    %c0 = arith.constant 0 : index
    %c0_0 = arith.constant 0 : index
    %c0_1 = arith.constant 0 : index
    %0 = vector.load %arg1[%c0, %c0_0, %c0_1] : memref<1x16x128xf32, #tpu.memory_space<vmem>>, vector<1x16x128xf32>
    %1 = vector.shape_cast %0 : vector<1x16x128xf32> to vector<16x128xf32>
    %c0_2 = arith.constant 0 : index
    %c0_3 = arith.constant 0 : index
    %2 = vector.load %arg2[%c0_2, %c0_3] : memref<128x384xf32, #tpu.memory_space<vmem>>, vector<128x384xf32>
    %cst = arith.constant dense<0.000000e+00> : vector<16x384xf32>
    %3 = tpu.matmul %1, %2, %cst {dimension_numbers = #tpu.dot_dimension_numbers<[1], [0], [0], [1], [0, 0, 1, 1], [], []>} : vector<16x128xf32>, vector<128x384xf32>, vector<16x384xf32> -> vector<16x384xf32>
    %4 = vector.extract_strided_slice %3 {offsets = [0, 0], sizes = [16, 128], strides = [1, 1]} : vector<16x384xf32> to vector<16x128xf32>
    %cst_4 = arith.constant 2.500000e-01 : f32
    %5 = vector.broadcast %cst_4 : f32 to vector<16x128xf32>
    %6 = arith.mulf %4, %5 : vector<16x128xf32>
    %7 = vector.extract_strided_slice %3 {offsets = [0, 128], sizes = [16, 128], strides = [1, 1]} : vector<16x384xf32> to vector<16x128xf32>
    %8 = vector.extract_strided_slice %3 {offsets = [0, 256], sizes = [16, 128], strides = [1, 1]} : vector<16x384xf32> to vector<16x128xf32>
    %9 = vector.extract_strided_slice %6 {offsets = [0, 0], sizes = [16, 16], strides = [1, 1]} : vector<16x128xf32> to vector<16x16xf32>
    %10 = vector.extract_strided_slice %7 {offsets = [0, 0], sizes = [16, 16], strides = [1, 1]} : vector<16x128xf32> to vector<16x16xf32>
    %11 = vector.extract_strided_slice %8 {offsets = [0, 0], sizes = [16, 16], strides = [1, 1]} : vector<16x128xf32> to vector<16x16xf32>
    %cst_5 = arith.constant dense<0.000000e+00> : vector<16x16xf32>
    %12 = tpu.matmul %9, %10, %cst_5 {dimension_numbers = #tpu.dot_dimension_numbers<[1], [1], [0], [0], [0, 0, 1, 0], [], []>} : vector<16x16xf32>, vector<16x16xf32>, vector<16x16xf32> -> vector<16x16xf32>
    %cst_6 = arith.constant dense<0xFF800000> : vector<16xf32>
    %13 = vector.multi_reduction <maximumf>, %12, %cst_6 [1] : vector<16x16xf32> to vector<16xf32>
    %14 = vector.shape_cast %13 : vector<16xf32> to vector<16x1xf32>
    %15 = vector.broadcast %14 : vector<16x1xf32> to vector<16x16xf32>
    %16 = arith.subf %12, %15 : vector<16x16xf32>
    %17 = math.exp %16 : vector<16x16xf32>
    %cst_7 = arith.constant dense<0.000000e+00> : vector<16xf32>
    %18 = vector.multi_reduction <add>, %17, %cst_7 [1] : vector<16x16xf32> to vector<16xf32>
    %19 = vector.shape_cast %18 : vector<16xf32> to vector<16x1xf32>
    %20 = tpu.reciprocal %19 {approx = true} : vector<16x1xf32> -> vector<16x1xf32>
    %21 = vector.broadcast %20 : vector<16x1xf32> to vector<16x16xf32>
    %22 = arith.mulf %17, %21 : vector<16x16xf32>
    %cst_8 = arith.constant dense<0.000000e+00> : vector<16x16xf32>
    %23 = tpu.matmul %22, %11, %cst_8 {dimension_numbers = #tpu.dot_dimension_numbers<[1], [0], [0], [1], [0, 0, 1, 1], [], []>} : vector<16x16xf32>, vector<16x16xf32>, vector<16x16xf32> -> vector<16x16xf32>
    %24 = vector.extract_strided_slice %6 {offsets = [0, 16], sizes = [16, 16], strides = [1, 1]} : vector<16x128xf32> to vector<16x16xf32>
    %25 = vector.extract_strided_slice %7 {offsets = [0, 16], sizes = [16, 16], strides = [1, 1]} : vector<16x128xf32> to vector<16x16xf32>
    %26 = vector.extract_strided_slice %8 {offsets = [0, 16], sizes = [16, 16], strides = [1, 1]} : vector<16x128xf32> to vector<16x16xf32>
    %cst_9 = arith.constant dense<0.000000e+00> : vector<16x16xf32>
    %27 = tpu.matmul %24, %25, %cst_9 {dimension_numbers = #tpu.dot_dimension_numbers<[1], [1], [0], [0], [0, 0, 1, 0], [], []>} : vector<16x16xf32>, vector<16x16xf32>, vector<16x16xf32> -> vector<16x16xf32>
    %cst_10 = arith.constant dense<0xFF800000> : vector<16xf32>
    %28 = vector.multi_reduction <maximumf>, %27, %cst_10 [1] : vector<16x16xf32> to vector<16xf32>
    %29 = vector.shape_cast %28 : vector<16xf32> to vector<16x1xf32>
    %30 = vector.broadcast %29 : vector<16x1xf32> to vector<16x16xf32>
    %31 = arith.subf %27, %30 : vector<16x16xf32>
    %32 = math.exp %31 : vector<16x16xf32>
    %cst_11 = arith.constant dense<0.000000e+00> : vector<16xf32>
    %33 = vector.multi_reduction <add>, %32, %cst_11 [1] : vector<16x16xf32> to vector<16xf32>
    %34 = vector.shape_cast %33 : vector<16xf32> to vector<16x1xf32>
    %35 = tpu.reciprocal %34 {approx = true} : vector<16x1xf32> -> vector<16x1xf32>
    %36 = vector.broadcast %35 : vector<16x1xf32> to vector<16x16xf32>
    %37 = arith.mulf %32, %36 : vector<16x16xf32>
    %cst_12 = arith.constant dense<0.000000e+00> : vector<16x16xf32>
    %38 = tpu.matmul %37, %26, %cst_12 {dimension_numbers = #tpu.dot_dimension_numbers<[1], [0], [0], [1], [0, 0, 1, 1], [], []>} : vector<16x16xf32>, vector<16x16xf32>, vector<16x16xf32> -> vector<16x16xf32>
    %39 = vector.extract_strided_slice %6 {offsets = [0, 32], sizes = [16, 16], strides = [1, 1]} : vector<16x128xf32> to vector<16x16xf32>
    %40 = vector.extract_strided_slice %7 {offsets = [0, 32], sizes = [16, 16], strides = [1, 1]} : vector<16x128xf32> to vector<16x16xf32>
    %41 = vector.extract_strided_slice %8 {offsets = [0, 32], sizes = [16, 16], strides = [1, 1]} : vector<16x128xf32> to vector<16x16xf32>
    %cst_13 = arith.constant dense<0.000000e+00> : vector<16x16xf32>
    %42 = tpu.matmul %39, %40, %cst_13 {dimension_numbers = #tpu.dot_dimension_numbers<[1], [1], [0], [0], [0, 0, 1, 0], [], []>} : vector<16x16xf32>, vector<16x16xf32>, vector<16x16xf32> -> vector<16x16xf32>
    %cst_14 = arith.constant dense<0xFF800000> : vector<16xf32>
    %43 = vector.multi_reduction <maximumf>, %42, %cst_14 [1] : vector<16x16xf32> to vector<16xf32>
    %44 = vector.shape_cast %43 : vector<16xf32> to vector<16x1xf32>
    %45 = vector.broadcast %44 : vector<16x1xf32> to vector<16x16xf32>
    %46 = arith.subf %42, %45 : vector<16x16xf32>
    %47 = math.exp %46 : vector<16x16xf32>
    %cst_15 = arith.constant dense<0.000000e+00> : vector<16xf32>
    %48 = vector.multi_reduction <add>, %47, %cst_15 [1] : vector<16x16xf32> to vector<16xf32>
    %49 = vector.shape_cast %48 : vector<16xf32> to vector<16x1xf32>
    %50 = tpu.reciprocal %49 {approx = true} : vector<16x1xf32> -> vector<16x1xf32>
    %51 = vector.broadcast %50 : vector<16x1xf32> to vector<16x16xf32>
    %52 = arith.mulf %47, %51 : vector<16x16xf32>
    %cst_16 = arith.constant dense<0.000000e+00> : vector<16x16xf32>
    %53 = tpu.matmul %52, %41, %cst_16 {dimension_numbers = #tpu.dot_dimension_numbers<[1], [0], [0], [1], [0, 0, 1, 1], [], []>} : vector<16x16xf32>, vector<16x16xf32>, vector<16x16xf32> -> vector<16x16xf32>
    %54 = vector.extract_strided_slice %6 {offsets = [0, 48], sizes = [16, 16], strides = [1, 1]} : vector<16x128xf32> to vector<16x16xf32>
    %55 = vector.extract_strided_slice %7 {offsets = [0, 48], sizes = [16, 16], strides = [1, 1]} : vector<16x128xf32> to vector<16x16xf32>
    %56 = vector.extract_strided_slice %8 {offsets = [0, 48], sizes = [16, 16], strides = [1, 1]} : vector<16x128xf32> to vector<16x16xf32>
    %cst_17 = arith.constant dense<0.000000e+00> : vector<16x16xf32>
    %57 = tpu.matmul %54, %55, %cst_17 {dimension_numbers = #tpu.dot_dimension_numbers<[1], [1], [0], [0], [0, 0, 1, 0], [], []>} : vector<16x16xf32>, vector<16x16xf32>, vector<16x16xf32> -> vector<16x16xf32>
    %cst_18 = arith.constant dense<0xFF800000> : vector<16xf32>
    %58 = vector.multi_reduction <maximumf>, %57, %cst_18 [1] : vector<16x16xf32> to vector<16xf32>
    %59 = vector.shape_cast %58 : vector<16xf32> to vector<16x1xf32>
    %60 = vector.broadcast %59 : vector<16x1xf32> to vector<16x16xf32>
    %61 = arith.subf %57, %60 : vector<16x16xf32>
    %62 = math.exp %61 : vector<16x16xf32>
    %cst_19 = arith.constant dense<0.000000e+00> : vector<16xf32>
    %63 = vector.multi_reduction <add>, %62, %cst_19 [1] : vector<16x16xf32> to vector<16xf32>
    %64 = vector.shape_cast %63 : vector<16xf32> to vector<16x1xf32>
    %65 = tpu.reciprocal %64 {approx = true} : vector<16x1xf32> -> vector<16x1xf32>
    %66 = vector.broadcast %65 : vector<16x1xf32> to vector<16x16xf32>
    %67 = arith.mulf %62, %66 : vector<16x16xf32>
    %cst_20 = arith.constant dense<0.000000e+00> : vector<16x16xf32>
    %68 = tpu.matmul %67, %56, %cst_20 {dimension_numbers = #tpu.dot_dimension_numbers<[1], [0], [0], [1], [0, 0, 1, 1], [], []>} : vector<16x16xf32>, vector<16x16xf32>, vector<16x16xf32> -> vector<16x16xf32>
    %69 = vector.extract_strided_slice %6 {offsets = [0, 64], sizes = [16, 16], strides = [1, 1]} : vector<16x128xf32> to vector<16x16xf32>
    %70 = vector.extract_strided_slice %7 {offsets = [0, 64], sizes = [16, 16], strides = [1, 1]} : vector<16x128xf32> to vector<16x16xf32>
    %71 = vector.extract_strided_slice %8 {offsets = [0, 64], sizes = [16, 16], strides = [1, 1]} : vector<16x128xf32> to vector<16x16xf32>
    %cst_21 = arith.constant dense<0.000000e+00> : vector<16x16xf32>
    %72 = tpu.matmul %69, %70, %cst_21 {dimension_numbers = #tpu.dot_dimension_numbers<[1], [1], [0], [0], [0, 0, 1, 0], [], []>} : vector<16x16xf32>, vector<16x16xf32>, vector<16x16xf32> -> vector<16x16xf32>
    %cst_22 = arith.constant dense<0xFF800000> : vector<16xf32>
    %73 = vector.multi_reduction <maximumf>, %72, %cst_22 [1] : vector<16x16xf32> to vector<16xf32>
    %74 = vector.shape_cast %73 : vector<16xf32> to vector<16x1xf32>
    %75 = vector.broadcast %74 : vector<16x1xf32> to vector<16x16xf32>
    %76 = arith.subf %72, %75 : vector<16x16xf32>
    %77 = math.exp %76 : vector<16x16xf32>
    %cst_23 = arith.constant dense<0.000000e+00> : vector<16xf32>
    %78 = vector.multi_reduction <add>, %77, %cst_23 [1] : vector<16x16xf32> to vector<16xf32>
    %79 = vector.shape_cast %78 : vector<16xf32> to vector<16x1xf32>
    %80 = tpu.reciprocal %79 {approx = true} : vector<16x1xf32> -> vector<16x1xf32>
    %81 = vector.broadcast %80 : vector<16x1xf32> to vector<16x16xf32>
    %82 = arith.mulf %77, %81 : vector<16x16xf32>
    %cst_24 = arith.constant dense<0.000000e+00> : vector<16x16xf32>
    %83 = tpu.matmul %82, %71, %cst_24 {dimension_numbers = #tpu.dot_dimension_numbers<[1], [0], [0], [1], [0, 0, 1, 1], [], []>} : vector<16x16xf32>, vector<16x16xf32>, vector<16x16xf32> -> vector<16x16xf32>
    %84 = vector.extract_strided_slice %6 {offsets = [0, 80], sizes = [16, 16], strides = [1, 1]} : vector<16x128xf32> to vector<16x16xf32>
    %85 = vector.extract_strided_slice %7 {offsets = [0, 80], sizes = [16, 16], strides = [1, 1]} : vector<16x128xf32> to vector<16x16xf32>
    %86 = vector.extract_strided_slice %8 {offsets = [0, 80], sizes = [16, 16], strides = [1, 1]} : vector<16x128xf32> to vector<16x16xf32>
    %cst_25 = arith.constant dense<0.000000e+00> : vector<16x16xf32>
    %87 = tpu.matmul %84, %85, %cst_25 {dimension_numbers = #tpu.dot_dimension_numbers<[1], [1], [0], [0], [0, 0, 1, 0], [], []>} : vector<16x16xf32>, vector<16x16xf32>, vector<16x16xf32> -> vector<16x16xf32>
    %cst_26 = arith.constant dense<0xFF800000> : vector<16xf32>
    %88 = vector.multi_reduction <maximumf>, %87, %cst_26 [1] : vector<16x16xf32> to vector<16xf32>
    %89 = vector.shape_cast %88 : vector<16xf32> to vector<16x1xf32>
    %90 = vector.broadcast %89 : vector<16x1xf32> to vector<16x16xf32>
    %91 = arith.subf %87, %90 : vector<16x16xf32>
    %92 = math.exp %91 : vector<16x16xf32>
    %cst_27 = arith.constant dense<0.000000e+00> : vector<16xf32>
    %93 = vector.multi_reduction <add>, %92, %cst_27 [1] : vector<16x16xf32> to vector<16xf32>
    %94 = vector.shape_cast %93 : vector<16xf32> to vector<16x1xf32>
    %95 = tpu.reciprocal %94 {approx = true} : vector<16x1xf32> -> vector<16x1xf32>
    %96 = vector.broadcast %95 : vector<16x1xf32> to vector<16x16xf32>
    %97 = arith.mulf %92, %96 : vector<16x16xf32>
    %cst_28 = arith.constant dense<0.000000e+00> : vector<16x16xf32>
    %98 = tpu.matmul %97, %86, %cst_28 {dimension_numbers = #tpu.dot_dimension_numbers<[1], [0], [0], [1], [0, 0, 1, 1], [], []>} : vector<16x16xf32>, vector<16x16xf32>, vector<16x16xf32> -> vector<16x16xf32>
    %99 = vector.extract_strided_slice %6 {offsets = [0, 96], sizes = [16, 16], strides = [1, 1]} : vector<16x128xf32> to vector<16x16xf32>
    %100 = vector.extract_strided_slice %7 {offsets = [0, 96], sizes = [16, 16], strides = [1, 1]} : vector<16x128xf32> to vector<16x16xf32>
    %101 = vector.extract_strided_slice %8 {offsets = [0, 96], sizes = [16, 16], strides = [1, 1]} : vector<16x128xf32> to vector<16x16xf32>
    %cst_29 = arith.constant dense<0.000000e+00> : vector<16x16xf32>
    %102 = tpu.matmul %99, %100, %cst_29 {dimension_numbers = #tpu.dot_dimension_numbers<[1], [1], [0], [0], [0, 0, 1, 0], [], []>} : vector<16x16xf32>, vector<16x16xf32>, vector<16x16xf32> -> vector<16x16xf32>
    %cst_30 = arith.constant dense<0xFF800000> : vector<16xf32>
    %103 = vector.multi_reduction <maximumf>, %102, %cst_30 [1] : vector<16x16xf32> to vector<16xf32>
    %104 = vector.shape_cast %103 : vector<16xf32> to vector<16x1xf32>
    %105 = vector.broadcast %104 : vector<16x1xf32> to vector<16x16xf32>
    %106 = arith.subf %102, %105 : vector<16x16xf32>
    %107 = math.exp %106 : vector<16x16xf32>
    %cst_31 = arith.constant dense<0.000000e+00> : vector<16xf32>
    %108 = vector.multi_reduction <add>, %107, %cst_31 [1] : vector<16x16xf32> to vector<16xf32>
    %109 = vector.shape_cast %108 : vector<16xf32> to vector<16x1xf32>
    %110 = tpu.reciprocal %109 {approx = true} : vector<16x1xf32> -> vector<16x1xf32>
    %111 = vector.broadcast %110 : vector<16x1xf32> to vector<16x16xf32>
    %112 = arith.mulf %107, %111 : vector<16x16xf32>
    %cst_32 = arith.constant dense<0.000000e+00> : vector<16x16xf32>
    %113 = tpu.matmul %112, %101, %cst_32 {dimension_numbers = #tpu.dot_dimension_numbers<[1], [0], [0], [1], [0, 0, 1, 1], [], []>} : vector<16x16xf32>, vector<16x16xf32>, vector<16x16xf32> -> vector<16x16xf32>
    %114 = vector.extract_strided_slice %6 {offsets = [0, 112], sizes = [16, 16], strides = [1, 1]} : vector<16x128xf32> to vector<16x16xf32>
    %115 = vector.extract_strided_slice %7 {offsets = [0, 112], sizes = [16, 16], strides = [1, 1]} : vector<16x128xf32> to vector<16x16xf32>
    %116 = vector.extract_strided_slice %8 {offsets = [0, 112], sizes = [16, 16], strides = [1, 1]} : vector<16x128xf32> to vector<16x16xf32>
    %cst_33 = arith.constant dense<0.000000e+00> : vector<16x16xf32>
    %117 = tpu.matmul %114, %115, %cst_33 {dimension_numbers = #tpu.dot_dimension_numbers<[1], [1], [0], [0], [0, 0, 1, 0], [], []>} : vector<16x16xf32>, vector<16x16xf32>, vector<16x16xf32> -> vector<16x16xf32>
    %cst_34 = arith.constant dense<0xFF800000> : vector<16xf32>
    %118 = vector.multi_reduction <maximumf>, %117, %cst_34 [1] : vector<16x16xf32> to vector<16xf32>
    %119 = vector.shape_cast %118 : vector<16xf32> to vector<16x1xf32>
    %120 = vector.broadcast %119 : vector<16x1xf32> to vector<16x16xf32>
    %121 = arith.subf %117, %120 : vector<16x16xf32>
    %122 = math.exp %121 : vector<16x16xf32>
    %cst_35 = arith.constant dense<0.000000e+00> : vector<16xf32>
    %123 = vector.multi_reduction <add>, %122, %cst_35 [1] : vector<16x16xf32> to vector<16xf32>
    %124 = vector.shape_cast %123 : vector<16xf32> to vector<16x1xf32>
    %125 = tpu.reciprocal %124 {approx = true} : vector<16x1xf32> -> vector<16x1xf32>
    %126 = vector.broadcast %125 : vector<16x1xf32> to vector<16x16xf32>
    %127 = arith.mulf %122, %126 : vector<16x16xf32>
    %cst_36 = arith.constant dense<0.000000e+00> : vector<16x16xf32>
    %128 = tpu.matmul %127, %116, %cst_36 {dimension_numbers = #tpu.dot_dimension_numbers<[1], [0], [0], [1], [0, 0, 1, 1], [], []>} : vector<16x16xf32>, vector<16x16xf32>, vector<16x16xf32> -> vector<16x16xf32>
    %129 = tpu.concatenate %23, %38, %53, %68, %83, %98, %113, %128 in 1 : vector<16x16xf32>, vector<16x16xf32>, vector<16x16xf32>, vector<16x16xf32>, vector<16x16xf32>, vector<16x16xf32>, vector<16x16xf32>, vector<16x16xf32> -> vector<16x128xf32>
    %c0_37 = arith.constant 0 : index
    %c0_38 = arith.constant 0 : index
    %130 = vector.load %arg3[%c0_37, %c0_38] : memref<128x128xf32, #tpu.memory_space<vmem>>, vector<128x128xf32>
    %cst_39 = arith.constant dense<0.000000e+00> : vector<16x128xf32>
    %131 = tpu.matmul %129, %130, %cst_39 {dimension_numbers = #tpu.dot_dimension_numbers<[1], [0], [0], [1], [0, 0, 1, 1], [], []>} : vector<16x128xf32>, vector<128x128xf32>, vector<16x128xf32> -> vector<16x128xf32>
    %c0_40 = arith.constant 0 : index
    %c0_41 = arith.constant 0 : index
    %132 = vector.load %arg4[%c0_40, %c0_41] : memref<1x128xf32, #tpu.memory_space<vmem>>, vector<1x128xf32>
    %133 = vector.broadcast %132 : vector<1x128xf32> to vector<16x128xf32>
    %134 = arith.addf %131, %133 : vector<16x128xf32>
    %c0_42 = arith.constant 0 : index
    %c0_43 = arith.constant 0 : index
    %c0_44 = arith.constant 0 : index
    %135 = vector.load %arg5[%c0_42, %c0_43, %c0_44] : memref<1x16x128xf32, #tpu.memory_space<vmem>>, vector<1x16x128xf32>
    %136 = vector.shape_cast %135 : vector<1x16x128xf32> to vector<16x128xf32>
    %137 = vector.shape_cast %134 : vector<16x128xf32> to vector<1x16x128xf32>
    tpu.vector_store %arg5[%c0_42, %c0_43, %c0_44], %137 {strides = array<i32>} : memref<1x16x128xf32, #tpu.memory_space<vmem>>, vector<1x16x128xf32>,
    return
  }
  func.func @transform_0(%arg0: i32) -> (i32, i32, i32) {
    %c0_i32 = arith.constant 0 : i32
    %c0_i32_0 = arith.constant 0 : i32
    %c0_i32_1 = arith.constant 0 : i32
    return %arg0, %c0_i32, %c0_i32_0 : i32, i32, i32
  }
  func.func @transform_1(%arg0: i32) -> (i32, i32) {
    %c0_i32 = arith.constant 0 : i32
    %c0_i32_0 = arith.constant 0 : i32
    %c0_i32_1 = arith.constant 0 : i32
    return %c0_i32, %c0_i32_0 : i32, i32
  }
  func.func @transform_2(%arg0: i32) -> (i32, i32) {
    %c0_i32 = arith.constant 0 : i32
    %c0_i32_0 = arith.constant 0 : i32
    %c0_i32_1 = arith.constant 0 : i32
    return %c0_i32, %c0_i32_0 : i32, i32
  }
  func.func @transform_3(%arg0: i32) -> (i32, i32) {
    %c0_i32 = arith.constant 0 : i32
    %c0_i32_0 = arith.constant 0 : i32
    %c0_i32_1 = arith.constant 0 : i32
    return %c0_i32, %c0_i32_0 : i32, i32
  }
  func.func @transform_4(%arg0: i32) -> (i32, i32, i32) {
    %c0_i32 = arith.constant 0 : i32
    %c0_i32_0 = arith.constant 0 : i32
    %c0_i32_1 = arith.constant 0 : i32
    return %arg0, %c0_i32, %c0_i32_0 : i32, i32, i32
  }
}

</mosaic_0001>

<bundles_post_ra>
// kernel: tpu_custom_call.1
= control target key start
LH: loop header
LB: loop body
LE: loop exit
PB: predicated region body
PF: predicated region fallthrough
CT: control target
= control target key end

     0   :  { %9 = vsyncpa [#allocation3], 0  ;;  %s3803_s0 = inlined_call_operand.hbm [shape: f32[2,16,128], index: 0, kind: input, shape index: {}]   ;;  %s3804_s1 = inlined_call_operand.hbm [shape: f32[128,384], index: 1, kind: input, shape index: {}]   ;;  %s3805_s2 = inlined_call_operand.hbm [shape: f32[128,128], index: 2, kind: input, shape index: {}]   ;;  %s3806_s3 = inlined_call_operand.vmem [shape: f32[1,128], index: 3, kind: input, shape index: {}]   ;;  %s3807_s4 = inlined_call_operand.hbm [shape: f32[2,16,128], index: 4, kind: output, shape index: {}]  }
   0x1   :  { %11 = vsyncpa [#allocation3 + $0x1], 0 }
   0x2   :  { %12 = vsyncpa [#allocation6], 0 }
   0x3   :  { %13 = vsyncpa [#allocation4], 0 }
   0x4   :  { %15 = vsyncpa [#allocation4 + $0x1], 0  ;;  %s3302_s15 = smov 0   ;;  %s3304_s16 = smov 0  }
   0x5   :  { %s3306_s17 = smov 0   ;;  %s3308_s18 = smov 0  }
   0x6 LB: > { %s3323_s19 = sadd.s32 4294967295, %s3257_s18   ;;  %s2324_s20 = sadd.s32 4294967294, %s3257_s18   ;;  %s3257_s18 = sphi %s3308_s18, %s3829_s18   ;;  %s3253_s17 = sphi %s3306_s17, %s3828_s17   ;;  %s3249_s16 = sphi %s3304_s16, %s3827_s16   ;;  %s3245_s15 = sphi %s3302_s15, %s3826_s15  }
   0x7   : > { %p41_p0 = scmp.ne.s32.totalorder %s3249_s16, %s3245_s15  ;;  %p3808_p1 = scmp.eq.s32.totalorder %s3323_s19, 0 }
   0x8   : > { %p134_p3 = scmp.eq.s32.totalorder %s2324_s20, 1  ;;  %p2325_p5 = scmp.ge.s32.totalorder %s3257_s18, 1 }
   0x9   : > { %p3332_p4 = por %p3808_p1, %p41_p0  ;;  %p141_p7 = scmp.lt.s32.totalorder %s3257_s18, 3 }
   0xa   : > { %p3337_p6 = por %p134_p3, %p41_p0  ;;  %s3259_s24 = smov [#allocation5]  }
   0xb   : > { %s3811_s21 = scalar_select %p3332_p4, 1, 0 }
   0xc   : > { %s3812_s22 = scalar_select %p3337_p6, 1, 0 }
   0xd   : > { %p3342_p8 = pnand %p2325_p5, %p141_p7  ;;  %s153_s25 = sshll.u32 %s3259_s24, 4  ;;  %s3346_s25 = int_to_ptr.vmem [resolvable:$true] %s153_s25 }
   0xe   : > { %s3260_s27 = smov [#allocation7]   ;;  %s3101_s5 = scalar_lea.hbm %s3804_s1, 6144 }
   0xf   : > { %p2863_p9 = pneg %p3342_p8  ;;  %s166_s28 = sshll.u32 %s3260_s27, 4  ;;  %s3357_s28 = int_to_ptr.vmem [resolvable:$true] %s166_s28 }
  0x10   : > { %p3102_p12 = scmp.ne.s32.totalorder %s3804_s1, %s3101_s5  ;;  %p3108_p5 = scmp.lt.u32.totalorder %s3101_s5, %s3804_s1 }
  0x11   : > { %p3353_p11 = pnand %p2863_p9, %p3808_p1 }
  0x13   : > { %p3103_p13 = pneg %p3353_p11 }
  0x15   : > { %p3104_p0 = pnand %p3103_p13, %p3102_p12 }
  0x17   : > { %p3105_p3 = pneg %p3104_p0 }
  0x19   : > { %p3110_p7 = pnand %p3108_p5, %p3105_p3 }
  0x1b   : > { %3113 = shalt.err (!%p3110_p7)
}
  0x1c   : > { %s3114_s10 = scalar_lea.vmem %s3346_s25, 6144  ;;  %p3122_p2 = scmp.lt.s32.totalorder %s3346_s25, %s3346_s25 }
  0x1d   : > { %p3115_p9 = scmp.ne.s32.totalorder %s3346_s25, %s3114_s10  ;;  %p3123_p12 = scmp.lt.s32.totalorder %s3114_s10, %s3114_s10 }
  0x1f   : > { %p3117_p10 = pnand %p3115_p9, %p3103_p13  ;;  %p3124_p0 = por %p3123_p12, %p3122_p2 }
  0x21   : > { %p3118_p1 = pneg %p3117_p10 }
  0x23   : > { %p3125_p6 = pnand %p3124_p0, %p3118_p1 }
  0x25   : > { %3128 = shalt.err (!%p3125_p6)
}
  0x26   : > { %s3261_s11 = smov 384   ;;  %s3262_s12 = smov 24  }
  0x27   : > { %2866 = dma.hbm_to_vmem [thread:$0]  (!%p3353_p11), %s3804_s1, 6144, %s3346_s25, [#allocation6], %s3261_s11, %s3261_s11, %s3262_s12  }
  0x28   : > { %s3129_s27 = scalar_lea.hbm %s3805_s2, 2048 }
  0x29   : > { %p3130_p2 = scmp.ne.s32.totalorder %s3805_s2, %s3129_s27  ;;  %p3136_p10 = scmp.lt.u32.totalorder %s3129_s27, %s3805_s2 }
  0x2b   : > { %p3132_p1 = pnand %p3130_p2, %p3103_p13 }
  0x2d   : > { %p3133_p6 = pneg %p3132_p1 }
  0x2f   : > { %p3138_p3 = pnand %p3136_p10, %p3133_p6 }
  0x31   : > { %3141 = shalt.err (!%p3138_p3)
}
  0x32   : > { %s3142_s25 = scalar_lea.vmem %s3357_s28, 2048  ;;  %p3150_p12 = scmp.lt.s32.totalorder %s3357_s28, %s3357_s28 }
  0x33   : > { %p3143_p5 = scmp.ne.s32.totalorder %s3357_s28, %s3142_s25  ;;  %p3151_p0 = scmp.lt.s32.totalorder %s3142_s25, %s3142_s25 }
  0x35   : > { %p3145_p7 = pnand %p3143_p5, %p3103_p13  ;;  %p3152_p2 = por %p3151_p0, %p3150_p12 }
  0x37   : > { %p3146_p9 = pneg %p3145_p7 }
  0x39   : > { %p3153_p1 = pnand %p3152_p2, %p3146_p9 }
  0x3b   : > { %3156 = shalt.err (!%p3153_p1)
}
  0x3c   : > { %s3263_s7 = smov 128   ;;  %s3264_s8 = smov 8  }
  0x3d   : > { %2869 = dma.hbm_to_vmem [thread:$0]  (!%p3353_p11), %s3805_s2, 2048, %s3357_s28, [#allocation6], %s3263_s7, %s3263_s7, %s3264_s8  }
  0x3e   : > { %s3415_s11 = sadd.s32 1, %s3257_s18   ;;  %s28_s13 = sadd.s32 1, %s3253_s17 }
  0x3f   : > { %s25_s12 = ssub.s32 %s3257_s18, %s3415_s11  ;;  %p35_p6 = scmp.ne.s32.totalorder %s3253_s17, %s3249_s16 }
  0x40   : > { %p26_p13 = scmp.eq.s32.totalorder %s25_s12, 0  ;;  %p36_p10 = scmp.eq.s32.totalorder %s3257_s18, 0 }
  0x41   : > { %p3815_p5 = scmp.eq.s32.totalorder %s3323_s19, 1  ;;  %p2880_p9 = scmp.lt.s32.totalorder %s3257_s18, 2 }
  0x42   : > { %s3424_s14 = scalar_select %p26_p13, %s3253_s17, %s28_s13  }
  0x43   : > { %p37_p3 = por %p36_p10, %p35_p6  ;;  %p3428_p7 = por %p3815_p5, %p35_p6 }
  0x44   : > { %s183_s20 = sand.u32 1, %s3253_s17   ;;  %s2391_s28 = sshll.u32 %s3257_s18, 8 }
  0x45   : > { %s3816_s26 = scalar_select %p3428_p7, 1, 0 }
  0x46   : > { %s2329_s24 = sshll.u32 %s183_s20, 4  ;;  %s3438_s30 = scalar_lea.hbm %s3803_s0, %s2391_s28 }
  0x47   : > { %s187_s5 = scalar_lea.vmem [#allocation2], %s2329_s24  ;;  %p3442_p11 = pnand %p2880_p9, %p37_p3 }
  0x48   : > { %s194_s6 = sshll.u32 %s187_s5, 4  ;;  %s3446_s9 = scalar_lea.sflag [#allocation3], %s183_s20  ;;  %s3440_s6 = int_to_ptr.vmem [resolvable:$true] %s194_s6 }
  0x49   : > { %s3157_s10 = scalar_lea.hbm %s3438_s30, 256  ;;  %p3159_p0 = pneg %p3442_p11 }
  0x4a   : > { %p3158_p12 = scmp.ne.s32.totalorder %s3438_s30, %s3157_s10  ;;  %s3162_s24 = scalar_lea.hbm %s3803_s0, 512 }
  0x4b   : > { %p3163_p13 = scmp.lt.u32.totalorder %s3438_s30, %s3803_s0  ;;  %p3164_p6 = scmp.lt.u32.totalorder %s3162_s24, %s3157_s10 }
  0x4c   : > { %p3160_p2 = pnand %p3159_p0, %p3158_p12  ;;  %p3166_p3 = scmp.lt.u32.totalorder %s3157_s10, %s3438_s30 }
  0x4d   : > { %p3165_p10 = por %p3164_p6, %p3163_p13 }
  0x4e   : > { %p3161_p1 = pneg %p3160_p2 }
  0x4f   : > { %p3167_p5 = por %p3166_p3, %p3165_p10 }
  0x51   : > { %p3168_p9 = pnand %p3167_p5, %p3161_p1 }
  0x53   : > { %3171 = shalt.err (!%p3168_p9)
}
  0x54   : > { %s3172_s20 = scalar_lea.vmem %s3440_s6, 256  ;;  %s3265_s29 = smov [#allocation2]  }
  0x55   : > { %p3173_p12 = scmp.ne.s32.totalorder %s3440_s6, %s3172_s20  ;;  %s3177_s5 = sshll.u32 %s3265_s29, 4  ;;  %s3178_s5 = int_to_ptr.vmem [resolvable:$false] %s3177_s5 }
  0x56   : > { %s3179_s12 = scalar_lea.vmem %s3178_s5, 512  ;;  %p3180_p4 = scmp.lt.s32.totalorder %s3440_s6, %s3178_s5 }
  0x57   : > { %p3175_p2 = pnand %p3173_p12, %p3159_p0  ;;  %p3181_p13 = scmp.lt.s32.totalorder %s3179_s12, %s3172_s20 }
  0x59   : > { %p3176_p7 = pneg %p3175_p2  ;;  %p3182_p6 = por %p3181_p13, %p3180_p4 }
  0x5b   : > { %p3183_p10 = pnand %p3182_p6, %p3176_p7 }
  0x5d   : > { %3186 = shalt.err (!%p3183_p10)
}
  0x5e   : > { %2873 = dma.hbm_to_vmem [thread:$0]  (!%p3442_p11), %s3438_s30, 256, %s3440_s6, %s3446_s9, %s3263_s7, %s3263_s7, %s3264_s8  }
  0x5f   : > { %206 = sbr.rel (%p3342_p8) target bundleno = 4185 (0x1059), region = 36  ;;  %s3480_s10 = sand.u32 (!%p3342_p8), 1, %s3249_s16  }
  0x60   : > { %s2333_s13 = sshll.u32 (!%p3342_p8), %s3480_s10, 4  ;;  %s209_s24 = scalar_lea.sflag (!%p3342_p8), [#allocation3], %s3480_s10 }
  0x61   : > { %s3486_s25 = scalar_lea.vmem (!%p3342_p8), [#allocation2], %s2333_s13  ;;  %p3818_p4 = scmp.ne.s32.totalorder (!%p3342_p8), %s3811_s21, 0 }
  0x66   : > { %3232 = dma.done.wait (%p3818_p4), %s209_s24, 256  }
  0x67   : > { %3234 = vsyncadd (%p3818_p4), %s209_s24, 4294967040  ;;  %p3819_p7 = scmp.eq.s32.totalorder %s3323_s19, 0 }
  0x69   : > { %3236 = dma.done.wait (%p3819_p7), [#allocation6], 8192   ;;  %p3820_p8 = pmov %p3819_p7 }
  0x6a   : > { %v3266_v0 = vmov 0.0   ;;  %v248_v1 = vld [vmem:[#allocation5 + $0x8] sm:$0xff]  ;;  %v251_v2 = vld [vmem:[#allocation5 + $0x20] sm:$0xff]  ;;  %v250_v5 = vld [vmem:[#allocation5 + $0x18] sm:$0xff]  ;;  %vm449_vm0 = vcmask 130048   ;;  %s3267_s21 = smov 96  }
  0x6b   : > { %3238 = vsyncadd (%p3820_p8), [#allocation6], 4294959104  ;;  %359 = vmatprep.mubr.f32.mxu0 %v3266_v0  ;;  %v247_v3 = vld [vmem:[#allocation5] sm:$0xff]  ;;  %v2675_v4 = vpack.c.bf16 %v251_v2, %v248_v1  ;;  %v254_v6 = vld [vmem:[#allocation5 + $0x38] sm:$0xff]  ;;  %s3268_s23 = smov 112   ;;  %s3269_s7 = smov 80  }
  0x6c   : > { %v257_v7 = vld [vmem:[#allocation5 + $0x50] sm:$0xff]  ;;  %v2677_v8 = vpack.c.bf16 %v250_v5, %v247_v3  ;;  %v256_v11 = vld [vmem:[#allocation5 + $0x48] sm:$0xff]  ;;  %v263_v13 = vld [vmem:[#allocation5 + $0x80] sm:$0xff]  ;;  %s3270_s8 = smov 64   ;;  %s3271_s30 = smov 48   ;;  %vm2100_vm2 = vcmask 261120  }
  0x6d   : > { %v2679_v9 = vpack.c.bf16 %v257_v7, %v254_v6  ;;  %v253_v10 = vld [vmem:[#allocation5 + $0x30] sm:$0xff]  ;;  %v260_v12 = vld [vmem:[#allocation5 + $0x68] sm:$0xff]  ;;  %2676 = vmatprep.subr.bf16.mxu0 %v2675_v4  ;;  %v259_v16 = vld [vmem:[#allocation5 + $0x60] sm:$0xff]  ;;  %s3272_s6 = smov 32   ;;  %s3273_s9 = smov 16   ;;  %vm2103_vm3 = vcmask 392192  }
  0x6e   : > { %2678 = vmatpush1.bf16.msra.mxu0 %v2677_v8  ;;  %v2681_v14 = vpack.c.bf16 %v256_v11, %v253_v10  ;;  %v2683_v15 = vpack.c.bf16 %v263_v13, %v260_v12  ;;  %v262_v17 = vld [vmem:[#allocation5 + $0x78] sm:$0xff]  ;;  %v269_v19 = vld [vmem:[#allocation5 + $0xb0] sm:$0xff]  ;;  %v268_v23 = vld [vmem:[#allocation5 + $0xa8] sm:$0xff]  ;;  %vm2106_vm4 = vcmask 523264   ;;  %vm2109_vm5 = vcmask 654336   ;;  %s244_s28 = scalar_lea.vmem [#allocation8], %s2333_s13 }
  0x6f   : > { %2680 = vmatprep.subr.bf16.mxu0 %v2679_v9  ;;  %v266_v18 = vld [vmem:[#allocation5 + $0x98] sm:$0xff]  ;;  %v2685_v20 = vpack.c.bf16 %v262_v17, %v259_v16  ;;  %v265_v22 = vld [vmem:[#allocation5 + $0x90] sm:$0xff]  ;;  %v272_v24 = vld [vmem:[#allocation5 + $0xc8] sm:$0xff]  ;;  %vm2112_vm6 = vcmask 785408   ;;  %vm2115_vm7 = vcmask 916480   ;;  %s2232_s27 = sshll.u32 %s244_s28, 4  ;;  %s3754_s27 = int_to_ptr.vmem [resolvable:$true] %s2232_s27 }
  0x70   : > { %v2687_v21 = vpack.c.bf16 %v269_v19, %v266_v18  ;;  %v275_v25 = vld [vmem:[#allocation5 + $0xe0] sm:$0xff]  ;;  %v2689_v27 = vpack.c.bf16 %v268_v23, %v265_v22  ;;  %v274_v30 = vld [vmem:[#allocation5 + $0xd8] sm:$0xff]  ;;  %v281_v32 = vld [vmem:[#allocation5 + $0x110] sm:$0xff]  ;;  %s2392_s5 = sshll.u32 %s3323_s19, 8  ;;  %s2219_s13 = scalar_lea.sflag [#allocation4], %s3480_s10 }
  0x71   : > { %v245_v26 = vld [vmem:[%s3486_s25] sm:$0xff]  ;;  %v2691_v28 = vpack.c.bf16 %v275_v25, %v272_v24  ;;  %v278_v31 = vld [vmem:[#allocation5 + $0xf8] sm:$0xff]  ;;  %v280_v36 = vld [vmem:[#allocation5 + $0x108] sm:$0xff]  ;;  %p3823_p0 = scmp.ne.s32.totalorder %s3816_s26, 0  ;;  %s3274_s19 = smov [#allocation8]  }
  0x72   : > { %2682 = vmatpush1.bf16.msra.mxu0 %v2681_v14  ;;  %2525 = vmatprep.mubr.f32.mxu1 %v245_v26  ;;  %v271_v29 = vld [vmem:[#allocation5 + $0xc0] sm:$0xff]  ;;  %v2695_v34 = vpack.c.bf16 %v281_v32, %v278_v31  ;;  %v277_v35 = vld [vmem:[#allocation5 + $0xf0] sm:$0xff]  ;;  %v284_v37 = vld [vmem:[#allocation5 + $0x128] sm:$0xff] }
  0x73   : > { %2684 = vmatprep.subr.bf16.mxu0 %v2683_v15  ;;  %v2693_v33 = vpack.c.bf16 %v274_v30, %v271_v29  ;;  %v287_v38 = vld [vmem:[#allocation5 + $0x140] sm:$0xff]  ;;  %v2697_v39 = vpack.c.bf16 %v280_v36, %v277_v35  ;;  %v286_v42 = vld [vmem:[#allocation5 + $0x138] sm:$0xff]  ;;  %v293_v44 = vld [vmem:[#allocation5 + $0x170] sm:$0xff] }
  0x74   : > { %v2699_v40 = vpack.c.bf16 %v287_v38, %v284_v37  ;;  %v283_v41 = vld [vmem:[#allocation5 + $0x120] sm:$0xff]  ;;  %v290_v43 = vld [vmem:[#allocation5 + $0x158] sm:$0xff]  ;;  %v289_v47 = vld [vmem:[#allocation5 + $0x150] sm:$0xff] }
  0x75   : > { %v2701_v45 = vpack.c.bf16 %v286_v42, %v283_v41  ;;  %v2703_v46 = vpack.c.bf16 %v293_v44, %v290_v43  ;;  %v292_v48 = vld [vmem:[#allocation5 + $0x168] sm:$0xff]  ;;  %v249_v51 = vld [vmem:[#allocation5 + $0x10] sm:$0xff]  ;;  %v255_v53 = vld [vmem:[#allocation5 + $0x40] sm:$0xff] }
  0x76   : > { %2686 = vmatpush1.bf16.msra.mxu0 %v2685_v20  ;;  %v2705_v49 = vpack.c.bf16 %v292_v48, %v289_v47  ;;  %v246_v50 = vld [vmem:[%s3486_s25 + $0x8] sm:$0xff]  ;;  %v261_v58 = vld [vmem:[#allocation5 + $0x70] sm:$0xff]  ;;  %v267_v62 = vld [vmem:[#allocation5 + $0xa0] sm:$0xff]  ;;  %s3759_s25 = scalar_lea.hbm %s3807_s4, %s2392_s5 }
  0x77   : > { %2688 = vmatprep.subr.bf16.mxu0 %v2687_v21  ;;  %v252_v52 = vld [vmem:[#allocation5 + $0x28] sm:$0xff]  ;;  %v258_v55 = vld [vmem:[#allocation5 + $0x58] sm:$0xff]  ;;  %vm3506_vm1 = vmpackc.low %vm449_vm0, %vm449_vm0 }
  0x78   : > { %v2707_v54 = vpack.c.bf16 %v252_v52, %v249_v51  ;;  %v2711_v57 = vpack.c.bf16 %v258_v55, %v255_v53  ;;  %v264_v59 = vld [vmem:[#allocation5 + $0x88] sm:$0xff]  ;;  %v270_v63 = vld [vmem:[#allocation5 + $0xb8] sm:$0xff]  ;;  %v273_v7 = vld [vmem:[#allocation5 + $0xd0] sm:$0xff] }
  0x79   : > { %v2719_v4 = vpack.c.bf16 %v270_v63, %v267_v62  ;;  %v276_v8 = vld [vmem:[#allocation5 + $0xe8] sm:$0xff]  ;;  %v279_v10 = vld [vmem:[#allocation5 + $0x100] sm:$0xff]  ;;  %v282_v11 = vld [vmem:[#allocation5 + $0x118] sm:$0xff] }
  0x7a   : > { %2690 = vmatpush1.bf16.msra.mxu0 %v2689_v27  ;;  %2708 = vmatprep.subr.bf16.mxu1 %v2707_v54  ;;  %v2723_v9 = vpack.c.bf16 %v276_v8, %v273_v7  ;;  %v2727_v13 = vpack.c.bf16 %v282_v11, %v279_v10  ;;  %v285_v14 = vld [vmem:[#allocation5 + $0x130] sm:$0xff]  ;;  %v288_v15 = vld [vmem:[#allocation5 + $0x148] sm:$0xff]  ;;  %v291_v17 = vld [vmem:[#allocation5 + $0x160] sm:$0xff] }
  0x7b   : > { %2692 = vmatprep.subr.bf16.mxu0 %v2691_v28  ;;  %2710 = vmatpush3.bf16.msra.mxu1 %v2707_v54  ;;  %v2731_v16 = vpack.c.bf16 %v288_v15, %v285_v14  ;;  %v294_v18 = vld [vmem:[#allocation5 + $0x178] sm:$0xff] }
  0x7c   : > { %2712 = vmatprep.subr.bf16.mxu1 %v2711_v57  ;;  %v2735_v19 = vpack.c.bf16 %v294_v18, %v291_v17 }
  0x7e   : > { %2694 = vmatpush1.bf16.msra.mxu0 %v2693_v33 }
  0x7f   : > { %2696 = vmatprep.subr.bf16.mxu0 %v2695_v34  ;;  %2714 = vmatpush3.bf16.msra.mxu1 %v2711_v57 }
  0x82   : > { %2698 = vmatpush1.bf16.msra.mxu0 %v2697_v39 }
  0x83   : > { %2700 = vmatprep.subr.bf16.mxu0 %v2699_v40 }
  0x86   : > { %2702 = vmatpush1.bf16.msra.mxu0 %v2701_v45 }
  0x87   : > { %2704 = vmatprep.subr.bf16.mxu0 %v2703_v46 }
  0x8a   : > { %2706 = vmatpush1.bf16.msra.mxu0 %v2705_v49 }
  0x8d   : > { %360 = vmatmul.mubr.f32.vlgmr.msra.gmra.mrb[0].mxu0 %v245_v26 }
  0x8e   : > { %365 = vmatprep.mubr.f32.mxu0 %v3266_v0  ;;  %v2715_v0 = vpack.c.bf16 %v264_v59, %v261_v58 }
  0x90   : > { %2716 = vmatprep.subr.bf16.mxu1 %v2715_v0 }
  0x91   : > { %366 = vmatmul.mubr.f32.gmra.mrb[2].mxu0 %v246_v50  ;;  %2718 = vmatpush3.bf16.msra.mxu1 %v2715_v0 }
  0x92   : > { %2720 = vmatprep.subr.bf16.mxu1 %v2719_v4 }
  0x95   : > { %2722 = vmatpush3.bf16.msra.mxu1 %v2719_v4 }
  0x96   : > { %2724 = vmatprep.subr.bf16.mxu1 %v2723_v9 }
  0x99   : > { %2726 = vmatpush3.bf16.msra.mxu1 %v2723_v9 }
  0x9a   : > { %2728 = vmatprep.subr.bf16.mxu1 %v2727_v13 }
  0x9d   : > { %2730 = vmatpush3.bf16.msra.mxu1 %v2727_v13 }
  0x9e   : > { %2732 = vmatprep.subr.bf16.mxu1 %v2731_v16 }
  0xa1   : > { %2734 = vmatpush3.bf16.msra.mxu1 %v2731_v16 }
  0xa2   : > { %2736 = vmatprep.subr.bf16.mxu1 %v2735_v19 }
  0xa5   : > { %2738 = vmatpush3.bf16.msra.mxu1 %v2735_v19 }
  0xa8   : > { %2526 = vmatmul.mubr.f32.vlgmr.msra.gmra.mrb[0].mxu1 %v246_v50 }
 0x160   : > { %v361_v56 = vpop.f32.mrb[0].mxu0 }
 0x161   : > { %v3500_v60 = vmul.f32 0.25, %v361_v56  ;;  %v363_v61 = vpop.f32.mrb[1].mxu0 }
 0x163   : > { %2532 = vmatprep.mubr.msk.f32.mxu0 %vm449_vm0, %v3500_v60 }
 0x164   : > { %v367_v1 = vpop.f32.mrb[2].mxu0 }
 0x165   : > { %v369_v2 = vpop.f32.mrb[3].mxu0  ;;  %v3520_v12 = vmul.f32 0.25, %v367_v1 }
 0x166   : > { %v3510_v5 = vpack.i.bf16 %v369_v2, %v363_v61  ;;  %v2739_v6 = vpack.c.bf16 %v369_v2, %v363_v61 }
 0x168   : > { %2938 = vrot.lane.b32.xlu1 %v3510_v5, %s3267_s21  ;;  %2741 = vmatprep.subr.msk.bf16.mxu0 %vm3506_vm1, %v2739_v6 }
 0x169   : > { %2744 = vmatpush3.bf16.xpose.msk.msra.mxu0 %vm3506_vm1, %v2739_v6 }
 0x16c   : > { %640 = vrot.lane.b32.xlu1 %v3500_v60, %s3268_s23 }
 0x170   : > { %2533 = vmatmul.mubr.msk.f32.vlgmr.msra.gmra.mrb[4].mxu0 %vm449_vm0, %v3520_v12 }
 0x17b   : > { %v2527_v24 = vpop.f32.mrb[0].mxu1 }
 0x17c   : > { %v438_v25 = vpop.f32.mrb[1].mxu1 }
 0x17d   : > { %v2745_v26 = vpack.c.bf16 %v2527_v24, %v438_v25  ;;  %v3534_v41 = vpack.i.bf16 %v2527_v24, %v438_v25 }
 0x17f   : > { %2746 = vmatprep.subr.bf16.mxu1 %v2745_v26 }
 0x180   : > { %2748 = vmatpush3.bf16.msra.mxu1 %v2745_v26 }
 0x1da   : > { %v2939_v42 = vpop.permute.xlu1 %2938 }
 0x1db   : > { %v2941_v48 = vunpack.i.h.bf16 %v2939_v42  ;;  %v2940_v49 = vunpack.i.l.bf16 %v2939_v42 }
 0x1dd   : > { %v2759_v52 = vpack.c.bf16 %v2941_v48, %v2940_v49 }
 0x1de   : > { %v641_v43 = vpop.permute.xlu1 %640 }
 0x243   : > { %v2534_v20 = vpop.f32.mrb[4].mxu0 }
 0x244   : > { %v528_v21 = vpop.f32.mrb[5].mxu0  ;;  %v540_v23 = vsel %vm449_vm0, %v2534_v20, -inf }
 0x245   : > { %v537_v22 = vsel %vm449_vm0, %v528_v21, -inf }
 0x246   : > { %538 = vmax.xlane.f32.xlu0 %v537_v22 }
 0x24a   : > { %541 = vmax.xlane.f32.xlu0 %v540_v23 }
 0x260   : > { %2933 = vrot.lane.b32.xlu0 %v3510_v5, %s3268_s23 }
 0x264   : > { %842 = vrot.lane.b32.xlu0 %v3500_v60, %s3267_s21 }
 0x2d3   : > { %v539_v27 = vpop.xlane.xlu0 %538 }
 0x2d4   : > { %v543_v28 = vsub.f32 %v528_v21, %v539_v27 }
 0x2d6   : > { %v545_v31 = vmul.f32 1.442695, %v543_v28 }
 0x2d7   : > { %v542_v29 = vpop.xlane.xlu0 %541 }
 0x2d8   : > { %v544_v30 = vsub.f32 %v2534_v20, %v542_v29 }
 0x2da   : > { %v547_v32 = vmul.f32 1.442695, %v544_v30 }
 0x2db   : > { %v2934_v33 = vpop.permute.xlu0 %2933 }
 0x2dc   : > { %3037 = vpow2.f32 %v547_v32  ;;  %v2936_v34 = vunpack.i.h.bf16 %v2934_v33  ;;  %v2935_v35 = vunpack.i.l.bf16 %v2934_v33 }
 0x2dd   : > { %3039 = vpow2.f32 %v545_v31 }
 0x2de   : > { %v2749_v36 = vpack.c.bf16 %v2936_v34, %v2935_v35 }
 0x2df   : > { %v843_v54 = vpop.permute.xlu0 %842 }
 0x2e0   : > { %2751 = vmatprep.subr.msk.bf16.mxu1 %vm3506_vm1, %v2749_v36 }
 0x2e6   : > { %v3038_v37 = vpop.eup %3037 }
 0x2e7   : > { %v552_v38 = vsel %vm449_vm0, %v3038_v37, 0.0  ;;  %v3040_v39 = vpop.eup %3039 }
 0x2e8   : > { %553 = vadd.xlane.f32.xlu1 %v552_v38  ;;  %v549_v40 = vsel %vm449_vm0, %v3040_v39, 0.0 }
 0x2ec   : > { %550 = vadd.xlane.f32.xlu1 %v549_v40 }
 0x2fd   : > { %642 = vrot.lane.b32.xlu1 %v3520_v12, %s3268_s23 }
 0x301   : > { %844 = vrot.lane.b32.xlu1 %v3520_v12, %s3267_s21 }
 0x375   : > { %v554_v44 = vpop.xlane.xlu1 %553 }
 0x376   : > { %3041 = vrcp.f32 %v554_v44 }
 0x379   : > { %v551_v45 = vpop.xlane.xlu1 %550 }
 0x37a   : > { %3043 = vrcp.f32 %v551_v45 }
 0x37d   : > { %v643_v53 = vpop.permute.xlu1 %642 }
 0x380   : > { %v3042_v46 = vpop.eup %3041 }
 0x381   : > { %v558_v51 = vmul.f32 %v3042_v46, %v3038_v37  ;;  %v845_v55 = vpop.permute.xlu1 %844 }
 0x384   : > { %v3044_v47 = vpop.eup %3043 }
 0x385   : > { %v557_v50 = vmul.f32 %v3044_v47, %v3040_v39 }
 0x387   : > { %2539 = vmatprep.mubr.msk.f32.mxu1 %vm449_vm0, %v557_v50 }
 0x388   : > { %2540 = vmatmul.mubr.msk.f32.vlgmr.msra.gmra.mrb[2].mxu1 %vm449_vm0, %v558_v51 }
 0x389   : > { %2754 = vmatpush3.bf16.xpose.msk.msra.mxu1 %vm3506_vm1, %v2749_v36  ;;  %2546 = vmatprep.mubr.msk.f32.mxu1 %vm449_vm0, %v641_v43 }
 0x38a   : > { %2761 = vmatprep.subr.msk.bf16.mxu1 %vm3506_vm1, %v2759_v52 }
 0x390   : > { %2547 = vmatmul.mubr.msk.f32.vlgmr.msra.gmra.mrb[4].mxu1 %vm449_vm0, %v643_v53 }
 0x391   : > { %2764 = vmatpush3.bf16.xpose.msk.msra.mxu1 %vm3506_vm1, %v2759_v52  ;;  %2560 = vmatprep.mubr.msk.f32.mxu1 %vm449_vm0, %v843_v54 }
 0x398   : > { %2561 = vmatmul.mubr.msk.f32.vlgmr.msra.gmra.mrb[6].mxu1 %vm449_vm0, %v845_v55 }
 0x45b   : > { %v3552_v56 = vpop.f32.mrb[2].mxu1 }
 0x45c   : > { %v3554_v57 = vpop.f32.mrb[3].mxu1 }
 0x463   : > { %v3556_v58 = vpop.f32.mrb[4].mxu1 }
 0x464   : > { %v3558_v59 = vpop.f32.mrb[5].mxu1 }
 0x465   : > { %v731_v46 = vsel %vm449_vm0, %v3558_v59, -inf }
 0x46b   : > { %v2562_v61 = vpop.f32.mrb[6].mxu1 }
 0x46c   : > { %v924_v62 = vpop.f32.mrb[7].mxu1  ;;  %v936_v63 = vsel %vm449_vm0, %v2562_v61, -inf }
 0x46d   : > { %937 = vmax.xlane.f32.xlu1 %v936_v63  ;;  %v933_v0 = vsel %vm449_vm0, %v924_v62, -inf }
 0x46e   : > { %934 = vmax.xlane.f32.xlu0 %v933_v0 }
 0x47e   : > { %2948 = vrot.lane.b32.xlu1 %v3510_v5, %s3269_s7 }
 0x482   : > { %2953 = vrot.lane.b32.xlu1 %v3510_v5, %s3270_s8 }
 0x486   : > { %1042 = vrot.lane.b32.xlu1 %v3500_v60, %s3269_s7 }
 0x48a   : > { %1242 = vrot.lane.b32.xlu1 %v3500_v60, %s3270_s8 }
 0x4fa   : > { %v938_v1 = vpop.xlane.xlu1 %937 }
 0x4fb   : > { %v940_v2 = vsub.f32 %v2562_v61, %v938_v1  ;;  %v935_v4 = vpop.xlane.xlu0 %934 }
 0x4fc   : > { %v939_v6 = vsub.f32 %v924_v62, %v935_v4 }
 0x4fd   : > { %v943_v7 = vmul.f32 1.442695, %v940_v2  ;;  %v734_v2 = vsel %vm449_vm0, %v3556_v58, -inf }
 0x4fe   : > { %v941_v8 = vmul.f32 1.442695, %v939_v6  ;;  %v2949_v16 = vpop.permute.xlu1 %2948 }
 0x4ff   : > { %3045 = vpow2.f32 %v943_v7  ;;  %v2951_v18 = vunpack.i.h.bf16 %v2949_v16  ;;  %v2950_v19 = vunpack.i.l.bf16 %v2949_v16 }
 0x500   : > { %3047 = vpow2.f32 %v941_v8 }
 0x501   : > { %v2769_v23 = vpack.c.bf16 %v2951_v18, %v2950_v19 }
 0x502   : > { %v2954_v24 = vpop.permute.xlu1 %2953 }
 0x503   : > { %v2956_v29 = vunpack.i.h.bf16 %v2954_v24  ;;  %v2955_v30 = vunpack.i.l.bf16 %v2954_v24 }
 0x505   : > { %v2779_v32 = vpack.c.bf16 %v2956_v29, %v2955_v30 }
 0x506   : > { %v1043_v31 = vpop.permute.xlu1 %1042 }
 0x509   : > { %v3046_v9 = vpop.eup %3045 }
 0x50a   : > { %v948_v10 = vsel %vm449_vm0, %v3046_v9, 0.0  ;;  %v3048_v11 = vpop.eup %3047  ;;  %v1243_v34 = vpop.permute.xlu1 %1242 }
 0x50b   : > { %949 = vadd.xlane.f32.xlu0 %v948_v10  ;;  %v945_v13 = vsel %vm449_vm0, %v3048_v11, 0.0 }
 0x50f   : > { %946 = vadd.xlane.f32.xlu0 %v945_v13 }
 0x525   : > { %2943 = vrot.lane.b32.xlu0 %v3534_v41, %s3267_s21 }
 0x529   : > { %1044 = vrot.lane.b32.xlu0 %v3520_v12, %s3269_s7 }
 0x52d   : > { %1244 = vrot.lane.b32.xlu0 %v3520_v12, %s3270_s8 }
 0x598   : > { %v950_v14 = vpop.xlane.xlu0 %949 }
 0x599   : > { %3049 = vrcp.f32 %v950_v14 }
 0x59c   : > { %v947_v15 = vpop.xlane.xlu0 %946 }
 0x59d   : > { %3051 = vrcp.f32 %v947_v15 }
 0x5a0   : > { %v2944_v17 = vpop.permute.xlu0 %2943 }
 0x5a1   : > { %v2946_v20 = vunpack.i.h.bf16 %v2944_v17  ;;  %v2945_v21 = vunpack.i.l.bf16 %v2944_v17 }
 0x5a3   : > { %v2765_v22 = vpack.c.bf16 %v2946_v20, %v2945_v21  ;;  %v3050_v25 = vpop.eup %3049 }
 0x5a4   : > { %v954_v28 = vmul.f32 %v3050_v25, %v3046_v9  ;;  %v1045_v33 = vpop.permute.xlu0 %1044 }
 0x5a5   : > { %2766 = vmatprep.subr.bf16.mxu1 %v2765_v22 }
 0x5a6   : > { %2768 = vmatpush3.bf16.msra.mxu1 %v2765_v22 }
 0x5a7   : > { %v3052_v26 = vpop.eup %3051  ;;  %2771 = vmatprep.subr.msk.bf16.mxu1 %vm3506_vm1, %v2769_v23 }
 0x5a8   : > { %v953_v27 = vmul.f32 %v3052_v26, %v3048_v11  ;;  %v1245_v35 = vpop.permute.xlu0 %1244 }
 0x5aa   : > { %2567 = vmatprep.mubr.msk.f32.mxu1 %vm449_vm0, %v953_v27 }
 0x5ab   : > { %2568 = vmatmul.mubr.msk.f32.vlgmr.msra.gmra.mrb[8].mxu1 %vm449_vm0, %v954_v28 }
 0x5ac   : > { %2574 = vmatprep.mubr.msk.f32.mxu1 %vm449_vm0, %v1043_v31 }
 0x5af   : > { %2774 = vmatpush3.bf16.xpose.msk.msra.mxu1 %vm3506_vm1, %v2769_v23 }
 0x5b0   : > { %2781 = vmatprep.subr.msk.bf16.mxu1 %vm3506_vm1, %v2779_v32 }
 0x5b6   : > { %2575 = vmatmul.mubr.msk.f32.vlgmr.msra.gmra.mrb[10].mxu1 %vm449_vm0, %v1045_v33 }
 0x5b7   : > { %2784 = vmatpush3.bf16.xpose.msk.msra.mxu1 %vm3506_vm1, %v2779_v32  ;;  %2588 = vmatprep.mubr.msk.f32.mxu1 %vm449_vm0, %v1243_v34 }
 0x5be   : > { %2589 = vmatmul.mubr.msk.f32.vlgmr.msra.gmra.mrb[12].mxu1 %vm449_vm0, %v1245_v35 }
 0x67e   : > { %v3592_v36 = vpop.f32.mrb[8].mxu1 }
 0x67f   : > { %v3594_v37 = vpop.f32.mrb[9].mxu1 }
 0x680   : > { %v3007_v38 = vpack.i.bf16 %v3592_v36, %v3594_v37 }
 0x689   : > { %v3598_v39 = vpop.f32.mrb[10].mxu1 }
 0x68a   : > { %v3600_v40 = vpop.f32.mrb[11].mxu1  ;;  %v1136_v6 = vsel %vm449_vm0, %v3598_v39, -inf }
 0x68b   : > { %v1133_v4 = vsel %vm449_vm0, %v3600_v40, -inf }
 0x691   : > { %v2590_v42 = vpop.f32.mrb[12].mxu1 }
 0x692   : > { %v1324_v43 = vpop.f32.mrb[13].mxu1  ;;  %v1336_v44 = vsel %vm449_vm0, %v2590_v42, -inf }
 0x693   : > { %1337 = vmax.xlane.f32.xlu0 %v1336_v44  ;;  %v1333_v45 = vsel %vm449_vm0, %v1324_v43, -inf }
 0x694   : > { %1334 = vmax.xlane.f32.xlu1 %v1333_v45 }
 0x6a5   : > { %2958 = vrot.lane.b32.xlu1 %v3534_v41, %s3270_s8 }
 0x6a9   : > { %1442 = vrot.lane.b32.xlu1 %v3500_v60, %s3271_s30 }
 0x6ad   : > { %1444 = vrot.lane.b32.xlu1 %v3520_v12, %s3271_s30 }
 0x6d1   : > { %732 = vmax.xlane.f32.xlu1 %v731_v46 }
 0x720   : > { %v1338_v47 = vpop.xlane.xlu0 %1337 }
 0x721   : > { %v1340_v48 = vsub.f32 %v2590_v42, %v1338_v47  ;;  %v1335_v49 = vpop.xlane.xlu1 %1334 }
 0x722   : > { %v1339_v50 = vsub.f32 %v1324_v43, %v1335_v49 }
 0x723   : > { %v1343_v51 = vmul.f32 1.442695, %v1340_v48 }
 0x724   : > { %v1341_v52 = vmul.f32 1.442695, %v1339_v50 }
 0x725   : > { %3053 = vpow2.f32 %v1343_v51  ;;  %v2959_v53 = vpop.permute.xlu1 %2958 }
 0x726   : > { %v2961_v54 = vunpack.i.h.bf16 %v2959_v53  ;;  %v2960_v55 = vunpack.i.l.bf16 %v2959_v53  ;;  %3055 = vpow2.f32 %v1341_v52 }
 0x728   : > { %v2785_v61 = vpack.c.bf16 %v2961_v54, %v2960_v55 }
 0x729   : > { %v1443_v18 = vpop.permute.xlu1 %1442 }
 0x72a   : > { %2786 = vmatprep.subr.bf16.mxu1 %v2785_v61 }
 0x72b   : > { %2788 = vmatpush3.bf16.msra.mxu1 %v2785_v61 }
 0x72d   : > { %v1445_v19 = vpop.permute.xlu1 %1444 }
 0x72f   : > { %v3054_v62 = vpop.eup %3053 }
 0x730   : > { %v1348_v63 = vsel %vm449_vm0, %v3054_v62, 0.0  ;;  %v3056_v0 = vpop.eup %3055 }
 0x731   : > { %1349 = vadd.xlane.f32.xlu0 %v1348_v63  ;;  %v1345_v1 = vsel %vm449_vm0, %v3056_v0, 0.0 }
 0x735   : > { %1346 = vadd.xlane.f32.xlu0 %v1345_v1 }
 0x74b   : > { %2963 = vrot.lane.b32.xlu0 %v3510_v5, %s3271_s30 }
 0x75e   : > { %v733_v22 = vpop.xlane.xlu1 %732 }
 0x75f   : > { %v737_v24 = vsub.f32 %v3558_v59, %v733_v22 }
 0x761   : > { %v739_v28 = vmul.f32 1.442695, %v737_v24 }
 0x76a   : > { %735 = vmax.xlane.f32.xlu0 %v734_v2 }
 0x76e   : > { %1134 = vmax.xlane.f32.xlu0 %v1133_v4 }
 0x772   : > { %1137 = vmax.xlane.f32.xlu0 %v1136_v6 }
 0x7be   : > { %v1350_v7 = vpop.xlane.xlu0 %1349 }
 0x7bf   : > { %3057 = vrcp.f32 %v1350_v7 }
 0x7c2   : > { %v1347_v8 = vpop.xlane.xlu0 %1346 }
 0x7c3   : > { %3059 = vrcp.f32 %v1347_v8 }
 0x7c6   : > { %v2964_v9 = vpop.permute.xlu0 %2963 }
 0x7c7   : > { %v2966_v10 = vunpack.i.h.bf16 %v2964_v9  ;;  %v2965_v11 = vunpack.i.l.bf16 %v2964_v9 }
 0x7c9   : > { %v2789_v13 = vpack.c.bf16 %v2966_v10, %v2965_v11  ;;  %v3058_v14 = vpop.eup %3057 }
 0x7ca   : > { %v1354_v17 = vmul.f32 %v3058_v14, %v3054_v62 }
 0x7cb   : > { %2791 = vmatprep.subr.msk.bf16.mxu1 %vm3506_vm1, %v2789_v13 }
 0x7cd   : > { %v3060_v15 = vpop.eup %3059 }
 0x7ce   : > { %v1353_v16 = vmul.f32 %v3060_v15, %v3056_v0 }
 0x7d0   : > { %2595 = vmatprep.mubr.msk.f32.mxu1 %vm449_vm0, %v1353_v16 }
 0x7d1   : > { %2596 = vmatmul.mubr.msk.f32.vlgmr.msra.gmra.mrb[14].mxu1 %vm449_vm0, %v1354_v17 }
 0x7d2   : > { %2794 = vmatpush3.bf16.xpose.msk.msra.mxu1 %vm3506_vm1, %v2789_v13  ;;  %2602 = vmatprep.mubr.msk.f32.mxu1 %vm449_vm0, %v1443_v18 }
 0x7d9   : > { %2603 = vmatmul.mubr.msk.f32.vlgmr.msra.gmra.mrb[16].mxu1 %vm449_vm0, %v1445_v19 }
 0x7f7   : > { %v736_v20 = vpop.xlane.xlu0 %735 }
 0x7f8   : > { %v738_v23 = vsub.f32 %v3556_v58, %v736_v20 }
 0x7fa   : > { %v741_v26 = vmul.f32 1.442695, %v738_v23 }
 0x7fb   : > { %v1135_v21 = vpop.xlane.xlu0 %1134 }
 0x7fc   : > { %v1139_v29 = vsub.f32 %v3600_v40, %v1135_v21  ;;  %3061 = vpow2.f32 %v741_v26 }
 0x7fd   : > { %3063 = vpow2.f32 %v739_v28 }
 0x7fe   : > { %v1141_v32 = vmul.f32 1.442695, %v1139_v29 }
 0x7ff   : > { %v1138_v25 = vpop.xlane.xlu0 %1137 }
 0x800   : > { %v1140_v27 = vsub.f32 %v3598_v39, %v1138_v25 }
 0x802   : > { %v1143_v30 = vmul.f32 1.442695, %v1140_v27 }
 0x804   : > { %3065 = vpow2.f32 %v1143_v30 }
 0x805   : > { %3067 = vpow2.f32 %v1141_v32 }
 0x806   : > { %v3062_v39 = vpop.eup %3061 }
 0x807   : > { %v3064_v42 = vpop.eup %3063  ;;  %v746_v43 = vsel %vm449_vm0, %v3062_v39, 0.0 }
 0x808   : > { %v743_v45 = vsel %vm449_vm0, %v3064_v42, 0.0 }
 0x80e   : > { %v3643_v44 = vpop.eup %3065 }
 0x80f   : > { %v3068_v46 = vpop.eup %3067  ;;  %v1148_v47 = vsel %vm449_vm0, %v3643_v44, 0.0 }
 0x810   : > { %v1145_v48 = vsel %vm449_vm0, %v3068_v46, 0.0 }
 0x8a4   : > { %v3634_v31 = vpop.f32.mrb[14].mxu1 }
 0x8a5   : > { %v3636_v33 = vpop.f32.mrb[15].mxu1 }
 0x8a6   : > { %v3017_v58 = vpack.i.bf16 %v3634_v31, %v3636_v33 }
 0x8ac   : > { %v2604_v59 = vpop.f32.mrb[16].mxu1 }
 0x8ad   : > { %v1524_v34 = vpop.f32.mrb[17].mxu1  ;;  %v1536_v35 = vsel %vm449_vm0, %v2604_v59, -inf }
 0x8ae   : > { %1537 = vmax.xlane.f32.xlu0 %v1536_v35  ;;  %v1533_v40 = vsel %vm449_vm0, %v1524_v34, -inf }
 0x8af   : > { %1534 = vmax.xlane.f32.xlu1 %v1533_v40 }
 0x8b2   : > { %747 = vadd.xlane.f32.xlu0 %v746_v43 }
 0x8b3   : > { %744 = vadd.xlane.f32.xlu1 %v743_v45 }
 0x8b6   : > { %1149 = vadd.xlane.f32.xlu0 %v1148_v47 }
 0x8b7   : > { %1146 = vadd.xlane.f32.xlu1 %v1145_v48 }
 0x8c8   : > { %2968 = vrot.lane.b32.xlu1 %v3534_v41, %s3268_s23 }
 0x8cc   : > { %2978 = vrot.lane.b32.xlu1 %v3534_v41, %s3271_s30 }
 0x8d0   : > { %2983 = vrot.lane.b32.xlu1 %v3510_v5, %s3272_s6 }
 0x93b   : > { %v1538_v49 = vpop.xlane.xlu0 %1537 }
 0x93c   : > { %v1540_v50 = vsub.f32 %v2604_v59, %v1538_v49  ;;  %v1535_v51 = vpop.xlane.xlu1 %1534 }
 0x93d   : > { %v1539_v52 = vsub.f32 %v1524_v34, %v1535_v51 }
 0x93e   : > { %v1543_v53 = vmul.f32 1.442695, %v1540_v50 }
 0x93f   : > { %v1541_v54 = vmul.f32 1.442695, %v1539_v52  ;;  %v748_v55 = vpop.xlane.xlu0 %747 }
 0x940   : > { %3069 = vpow2.f32 %v1543_v53  ;;  %v745_v61 = vpop.xlane.xlu1 %744 }
 0x941   : > { %3071 = vpow2.f32 %v1541_v54 }
 0x942   : > { %3073 = vrcp.f32 %v748_v55 }
 0x943   : > { %3075 = vrcp.f32 %v745_v61  ;;  %v1150_v17 = vpop.xlane.xlu0 %1149 }
 0x944   : > { %v1147_v62 = vpop.xlane.xlu1 %1146 }
 0x945   : > { %3077 = vrcp.f32 %v1147_v62 }
 0x946   : > { %3079 = vrcp.f32 %v1150_v17 }
 0x948   : > { %v2969_v63 = vpop.permute.xlu1 %2968 }
 0x949   : > { %v2971_v0 = vunpack.i.h.bf16 %v2969_v63  ;;  %v2970_v1 = vunpack.i.l.bf16 %v2969_v63 }
 0x94a   : > { %v3070_v2 = vpop.eup %3069 }
 0x94b   : > { %v3072_v4 = vpop.eup %3071  ;;  %v2755_v6 = vpack.c.bf16 %v2971_v0, %v2970_v1  ;;  %v1548_v7 = vsel %vm449_vm0, %v3070_v2, 0.0 }
 0x94c   : > { %v3074_v8 = vpop.eup %3073  ;;  %1549 = vadd.xlane.f32.xlu0 %v1548_v7  ;;  %v1545_v9 = vsel %vm449_vm0, %v3072_v4, 0.0  ;;  %v2979_v16 = vpop.permute.xlu1 %2978 }
 0x94d   : > { %v3076_v10 = vpop.eup %3075  ;;  %1546 = vadd.xlane.f32.xlu1 %v1545_v9  ;;  %2756 = vmatprep.subr.bf16.mxu0 %v2755_v6  ;;  %v752_v14 = vmul.f32 %v3074_v8, %v3062_v39  ;;  %v2981_v22 = vunpack.i.h.bf16 %v2979_v16  ;;  %v2980_v23 = vunpack.i.l.bf16 %v2979_v16 }
 0x94e   : > { %2758 = vmatpush3.bf16.msra.mxu0 %v2755_v6  ;;  %v751_v11 = vmul.f32 %v3076_v10, %v3064_v42 }
 0x94f   : > { %v3078_v13 = vpop.eup %3077  ;;  %v2795_v28 = vpack.c.bf16 %v2981_v22, %v2980_v23 }
 0x950   : > { %2553 = vmatprep.mubr.msk.f32.mxu0 %vm449_vm0, %v751_v11  ;;  %v1153_v15 = vmul.f32 %v3078_v13, %v3068_v46  ;;  %v2984_v18 = vpop.permute.xlu1 %2983  ;;  %v3080_v27 = vpop.eup %3079 }
 0x951   : > { %2554 = vmatmul.mubr.msk.f32.vlgmr.msra.gmra.mrb[6].mxu0 %vm449_vm0, %v752_v14  ;;  %v2986_v29 = vunpack.i.h.bf16 %v2984_v18  ;;  %v2985_v30 = vunpack.i.l.bf16 %v2984_v18  ;;  %v1154_v59 = vmul.f32 %v3080_v27, %v3643_v44 }
 0x952   : > { %2581 = vmatprep.mubr.msk.f32.mxu0 %vm449_vm0, %v1153_v15 }
 0x953   : > { %v2799_v35 = vpack.c.bf16 %v2986_v29, %v2985_v30 }
 0x95e   : > { %1642 = vrot.lane.b32.xlu1 %v3500_v60, %s3272_s6 }
 0x962   : > { %2973 = vrot.lane.b32.xlu0 %v3534_v41, %s3269_s7 }
 0x966   : > { %1644 = vrot.lane.b32.xlu0 %v3520_v12, %s3272_s6 }
 0x9d9   : > { %v1550_v19 = vpop.xlane.xlu0 %1549 }
 0x9da   : > { %3081 = vrcp.f32 %v1550_v19  ;;  %v1547_v20 = vpop.xlane.xlu1 %1546 }
 0x9db   : > { %3083 = vrcp.f32 %v1547_v20 }
 0x9dd   : > { %v2974_v21 = vpop.permute.xlu0 %2973 }
 0x9de   : > { %v2976_v24 = vunpack.i.h.bf16 %v2974_v21  ;;  %v2975_v25 = vunpack.i.l.bf16 %v2974_v21  ;;  %v1643_v42 = vpop.permute.xlu1 %1642 }
 0x9e0   : > { %v2775_v26 = vpack.c.bf16 %v2976_v24, %v2975_v25 }
 0x9e1   : > { %v1645_v43 = vpop.permute.xlu0 %1644 }
 0x9e2   : > { %2776 = vmatprep.subr.bf16.mxu0 %v2775_v26 }
 0x9e3   : > { %2778 = vmatpush3.bf16.msra.mxu0 %v2775_v26 }
 0x9e4   : > { %v3082_v32 = vpop.eup %3081  ;;  %2796 = vmatprep.subr.bf16.mxu0 %v2795_v28 }
 0x9e5   : > { %v3084_v34 = vpop.eup %3083  ;;  %v1554_v40 = vmul.f32 %v3082_v32, %v3070_v2 }
 0x9e6   : > { %2582 = vmatmul.mubr.msk.f32.vlgmr.msra.gmra.mrb[8].mxu0 %vm449_vm0, %v1154_v59  ;;  %v1553_v39 = vmul.f32 %v3084_v34, %v3072_v4 }
 0x9e7   : > { %2798 = vmatpush3.bf16.msra.mxu0 %v2795_v28 }
 0x9e8   : > { %2609 = vmatprep.mubr.msk.f32.mxu0 %vm449_vm0, %v1553_v39  ;;  %2801 = vmatprep.subr.msk.bf16.mxu0 %vm3506_vm1, %v2799_v35 }
 0x9ea   : > { %2610 = vmatmul.mubr.msk.f32.vlgmr.msra.gmra.mrb[10].mxu0 %vm449_vm0, %v1554_v40 }
 0x9eb   : > { %2616 = vmatprep.mubr.msk.f32.mxu0 %vm449_vm0, %v1643_v42 }
 0x9f0   : > { %2804 = vmatpush3.bf16.xpose.msk.msra.mxu0 %vm3506_vm1, %v2799_v35 }
 0x9f7   : > { %2617 = vmatmul.mubr.msk.f32.vlgmr.msra.gmra.mrb[12].mxu0 %vm449_vm0, %v1645_v43 }
 0xa24   : > { %v3676_v44 = vpop.f32.mrb[6].mxu0 }
 0xa25   : > { %v3678_v45 = vpop.f32.mrb[7].mxu0 }
 0xa26   : > { %v3002_v46 = vpack.i.bf16 %v3676_v44, %v3678_v45  ;;  %v2119_v44 = vld [vmem:[#allocation7 + $0x8] sm:$0xff]  ;;  %v2120_v45 = vld [vmem:[#allocation7 + $0x10] sm:$0xff] }
 0xab9   : > { %v3682_v47 = vpop.f32.mrb[8].mxu0 }
 0xaba   : > { %v3684_v48 = vpop.f32.mrb[9].mxu0 }
 0xabb   : > { %v3012_v49 = vpack.i.bf16 %v3682_v47, %v3684_v48 }
 0xabd   : > { %v3688_v50 = vpop.f32.mrb[10].mxu0 }
 0xabe   : > { %v3690_v51 = vpop.f32.mrb[11].mxu0 }
 0xabf   : > { %v3022_v52 = vpack.i.bf16 %v3688_v50, %v3690_v51  ;;  %v2122_v50 = vld [vmem:[#allocation7 + $0x20] sm:$0xff]  ;;  %v2123_v51 = vld [vmem:[#allocation7 + $0x28] sm:$0xff] }
 0xaca   : > { %v2618_v53 = vpop.f32.mrb[12].mxu0 }
 0xacb   : > { %v1724_v54 = vpop.f32.mrb[13].mxu0  ;;  %v1736_v55 = vsel %vm449_vm0, %v2618_v53, -inf }
 0xacc   : > { %1737 = vmax.xlane.f32.xlu0 %v1736_v55  ;;  %v1733_v61 = vsel %vm449_vm0, %v1724_v54, -inf  ;;  %v2121_v55 = vld [vmem:[#allocation7 + $0x18] sm:$0xff] }
 0xacd   : > { %1734 = vmax.xlane.f32.xlu1 %v1733_v61  ;;  %v2823_v61 = vpack.c.bf16 %v2121_v55, %v2120_v45 }
 0xade   : > { %2988 = vrot.lane.b32.xlu1 %v3534_v41, %s3272_s6 }
 0xae2   : > { %1842 = vrot.lane.b32.xlu1 %v3500_v60, %s3273_s9 }
 0xae6   : > { %1844 = vrot.lane.b32.xlu1 %v3520_v12, %s3273_s9 }
 0xb59   : > { %v1738_v62 = vpop.xlane.xlu0 %1737 }
 0xb5a   : > { %v1740_v63 = vsub.f32 %v2618_v53, %v1738_v62  ;;  %v1735_v0 = vpop.xlane.xlu1 %1734  ;;  %v2124_v62 = vld [vmem:[#allocation7 + $0x30] sm:$0xff] }
 0xb5b   : > { %v1739_v1 = vsub.f32 %v1724_v54, %v1735_v0  ;;  %v2118_v54 = vld [vmem:[#allocation7] sm:$0xff] }
 0xb5c   : > { %v1743_v2 = vmul.f32 1.442695, %v1740_v63  ;;  %v2125_v63 = vld [vmem:[#allocation7 + $0x38] sm:$0xff] }
 0xb5d   : > { %v1741_v4 = vmul.f32 1.442695, %v1739_v1  ;;  %v2831_v0 = vpack.c.bf16 %v2125_v63, %v2124_v62  ;;  %v2126_v1 = vld [vmem:[#allocation7 + $0x40] sm:$0xff] }
 0xb5e   : > { %3085 = vpow2.f32 %v1743_v2  ;;  %v2989_v6 = vpop.permute.xlu1 %2988  ;;  %v2127_v2 = vld [vmem:[#allocation7 + $0x48] sm:$0xff] }
 0xb5f   : > { %v2991_v7 = vunpack.i.h.bf16 %v2989_v6  ;;  %v2990_v8 = vunpack.i.l.bf16 %v2989_v6  ;;  %3087 = vpow2.f32 %v1741_v4  ;;  %v2835_v4 = vpack.c.bf16 %v2127_v2, %v2126_v1  ;;  %v2128_v6 = vld [vmem:[#allocation7 + $0x50] sm:$0xff] }
 0xb61   : > { %v2805_v9 = vpack.c.bf16 %v2991_v7, %v2990_v8  ;;  %v2129_v7 = vld [vmem:[#allocation7 + $0x58] sm:$0xff] }
 0xb62   : > { %v1843_v23 = vpop.permute.xlu1 %1842  ;;  %v2839_v8 = vpack.c.bf16 %v2129_v7, %v2128_v6 }
 0xb63   : > { %2806 = vmatprep.subr.bf16.mxu1 %v2805_v9 }
 0xb64   : > { %2808 = vmatpush3.bf16.msra.mxu1 %v2805_v9  ;;  %v2130_v9 = vld [vmem:[#allocation7 + $0x60] sm:$0xff] }
 0xb68   : > { %v3086_v10 = vpop.eup %3085 }
 0xb69   : > { %v1748_v60 = vsel %vm449_vm0, %v3086_v10, 0.0  ;;  %v3088_v11 = vpop.eup %3087 }
 0xb6a   : > { %1749 = vadd.xlane.f32.xlu0 %v1748_v60  ;;  %v1745_v12 = vsel %vm449_vm0, %v3088_v11, 0.0 }
 0xb6e   : > { %1746 = vadd.xlane.f32.xlu0 %v1745_v12  ;;  %v2133_v12 = vld [vmem:[#allocation7 + $0x78] sm:$0xff] }
 0xb84   : > { %2993 = vrot.lane.b32.xlu0 %v3510_v5, %s3273_s9  ;;  %v1845_v5 = vpop.permute.xlu1 %1844 }
 0xbf7   : > { %v1750_v13 = vpop.xlane.xlu0 %1749 }
 0xbf8   : > { %3089 = vrcp.f32 %v1750_v13 }
 0xbfb   : > { %v1747_v14 = vpop.xlane.xlu0 %1746 }
 0xbfc   : > { %3091 = vrcp.f32 %v1747_v14 }
 0xbff   : > { %v2994_v15 = vpop.permute.xlu0 %2993 }
 0xc00   : > { %v2996_v16 = vunpack.i.h.bf16 %v2994_v15  ;;  %v2995_v17 = vunpack.i.l.bf16 %v2994_v15 }
 0xc02   : > { %v2809_v18 = vpack.c.bf16 %v2996_v16, %v2995_v17  ;;  %v3090_v19 = vpop.eup %3089 }
 0xc03   : > { %v1754_v22 = vmul.f32 %v3090_v19, %v3086_v10  ;;  %v2131_v10 = vld [vmem:[#allocation7 + $0x68] sm:$0xff] }
 0xc04   : > { %2811 = vmatprep.subr.msk.bf16.mxu1 %vm3506_vm1, %v2809_v18  ;;  %v2843_v60 = vpack.c.bf16 %v2131_v10, %v2130_v9 }
 0xc06   : > { %v3092_v20 = vpop.eup %3091 }
 0xc07   : > { %v1753_v21 = vmul.f32 %v3092_v20, %v3088_v11  ;;  %v2132_v11 = vld [vmem:[#allocation7 + $0x70] sm:$0xff] }
 0xc08   : > { %v2847_v13 = vpack.c.bf16 %v2133_v12, %v2132_v11 }
 0xc09   : > { %2623 = vmatprep.mubr.msk.f32.mxu1 %vm449_vm0, %v1753_v21 }
 0xc0a   : > { %2624 = vmatmul.mubr.msk.f32.vlgmr.msra.gmra.mrb[18].mxu1 %vm449_vm0, %v1754_v22 }
 0xc0b   : > { %2814 = vmatpush3.bf16.xpose.msk.msra.mxu1 %vm3506_vm1, %v2809_v18  ;;  %2630 = vmatprep.mubr.msk.f32.mxu1 %vm449_vm0, %v1843_v23 }
 0xc12   : > { %2631 = vmatmul.mubr.msk.f32.vlgmr.msra.gmra.mrb[20].mxu1 %vm449_vm0, %v1845_v5 }
 0xcdd   : > { %v2625_v24 = vpop.f32.mrb[18].mxu1 }
 0xcde   : > { %v1833_v25 = vpop.f32.mrb[19].mxu1 }
 0xcdf   : > { %v3027_v26 = vpack.i.bf16 %v2625_v24, %v1833_v25 }
 0xce5   : > { %v2632_v27 = vpop.f32.mrb[20].mxu1 }
 0xce6   : > { %v1924_v28 = vpop.f32.mrb[21].mxu1  ;;  %v1936_v29 = vsel %vm449_vm0, %v2632_v27, -inf }
 0xce7   : > { %1937 = vmax.xlane.f32.xlu0 %v1936_v29  ;;  %v1933_v30 = vsel %vm449_vm0, %v1924_v28, -inf }
 0xce8   : > { %1934 = vmax.xlane.f32.xlu1 %v1933_v30 }
 0xcf9   : > { %2998 = vrot.lane.b32.xlu1 %v3534_v41, %s3273_s9 }
 0xcfd   : > { %3008 = vrot.lane.b32.xlu1 %v3007_v38, %s3272_s6 }
 0xd01   : > { %3013 = vrot.lane.b32.xlu1 %v3012_v49, %s3271_s30 }
 0xd05   : > { %3018 = vrot.lane.b32.xlu1 %v3017_v58, %s3270_s8 }
 0xd09   : > { %3028 = vrot.lane.b32.xlu1 %v3027_v26, %s3267_s21  ;;  %s3187_s21 = scalar_lea.vmem %s3754_s27, 256 }
 0xd0a   : > { %p3188_p11 = scmp.ne.s32.totalorder %s3754_s27, %s3187_s21 }
 0xd0c   : > { %p3189_p1 = pnand %p3188_p11, %p3823_p0 }
 0xd0e   : > { %p3190_p3 = pneg %p3189_p1 }
 0xd74   : > { %v1938_v3 = vpop.xlane.xlu0 %1937 }
 0xd75   : > { %v1940_v32 = vsub.f32 %v2632_v27, %v1938_v3  ;;  %v1935_v41 = vpop.xlane.xlu1 %1934 }
 0xd76   : > { %v1939_v59 = vsub.f32 %v1924_v28, %v1935_v41 }
 0xd77   : > { %v1943_v34 = vmul.f32 1.442695, %v1940_v32 }
 0xd78   : > { %v1941_v35 = vmul.f32 1.442695, %v1939_v59 }
 0xd79   : > { %v2999_v36 = vpop.permute.xlu1 %2998 }
 0xd7a   : > { %3093 = vpow2.f32 %v1941_v35  ;;  %v3001_v37 = vunpack.i.h.bf16 %v2999_v36  ;;  %v3000_v38 = vunpack.i.l.bf16 %v2999_v36 }
 0xd7b   : > { %3095 = vpow2.f32 %v1943_v34 }
 0xd7c   : > { %v2815_v39 = vpack.c.bf16 %v3001_v37, %v3000_v38 }
 0xd7d   : > { %v3009_v17 = vpop.permute.xlu1 %3008 }
 0xd7e   : > { %2816 = vmatprep.subr.bf16.mxu0 %v2815_v39  ;;  %v3011_v5 = vunpack.i.h.bf16 %v3009_v17  ;;  %v3010_v24 = vunpack.i.l.bf16 %v3009_v17 }
 0xd7f   : > { %2818 = vmatpush3.bf16.msra.mxu0 %v2815_v39 }
 0xd81   : > { %v3014_v21 = vpop.permute.xlu1 %3013 }
 0xd82   : > { %v3016_v27 = vunpack.i.h.bf16 %v3014_v21  ;;  %v3015_v28 = vunpack.i.l.bf16 %v3014_v21 }
 0xd84   : > { %v3094_v40 = vpop.eup %3093 }
 0xd85   : > { %v1945_v31 = vsel %vm449_vm0, %v3094_v40, 0.0  ;;  %v3096_v33 = vpop.eup %3095  ;;  %v3019_v29 = vpop.permute.xlu1 %3018 }
 0xd86   : > { %1946 = vadd.xlane.f32.xlu0 %v1945_v31  ;;  %v1948_v58 = vsel %vm449_vm0, %v3096_v33, 0.0  ;;  %v3021_v41 = vunpack.i.h.bf16 %v3019_v29  ;;  %v3020_v59 = vunpack.i.l.bf16 %v3019_v29 }
 0xd8a   : > { %1949 = vadd.xlane.f32.xlu0 %v1948_v58 }
 0xda0   : > { %3003 = vrot.lane.b32.xlu0 %v3002_v46, %s3273_s9  ;;  %v2819_v46 = vpack.c.bf16 %v2119_v44, %v2118_v54 }
 0xda2   : > { %2820 = vmatprep.subr.bf16.mxu0 %v2819_v46 }
 0xda4   : > { %3023 = vrot.lane.b32.xlu0 %v3022_v52, %s3269_s7  ;;  %v2827_v52 = vpack.c.bf16 %v2123_v51, %v2122_v50 }
 0xe13   : > { %v1947_v42 = vpop.xlane.xlu0 %1946 }
 0xe14   : > { %3097 = vrcp.f32 %v1947_v42 }
 0xe17   : > { %v1950_v43 = vpop.xlane.xlu0 %1949 }
 0xe18   : > { %3099 = vrcp.f32 %v1950_v43 }
 0xe1b   : > { %v3004_v18 = vpop.permute.xlu0 %3003 }
 0xe1c   : > { %v3006_v19 = vunpack.i.h.bf16 %v3004_v18  ;;  %v3005_v20 = vunpack.i.l.bf16 %v3004_v18 }
 0xe1e   : > { %v3098_v47 = vpop.eup %3097  ;;  %v2099_v22 = vsel %vm449_vm0, %v3552_v56, %v3006_v19  ;;  %v2098_v23 = vsel %vm449_vm0, %v3554_v57, %v3005_v20  ;;  %v3029_v57 = vpop.permute.xlu1 %3028 }
 0xe1f   : > { %v1953_v48 = vmul.f32 %v3098_v47, %v3094_v40  ;;  %v2101_v25 = vsel %vm2100_vm2, %v2098_v23, %v3010_v24  ;;  %v2102_v26 = vsel %vm2100_vm2, %v2099_v22, %v3011_v5  ;;  %v3024_v30 = vpop.permute.xlu0 %3023  ;;  %v3031_v39 = vunpack.i.h.bf16 %v3029_v57 }
 0xe20   : > { %v2105_v3 = vsel %vm2103_vm3, %v2102_v26, %v3016_v27  ;;  %v2104_v32 = vsel %vm2103_vm3, %v2101_v25, %v3015_v28  ;;  %v3026_v34 = vunpack.i.h.bf16 %v3024_v30  ;;  %v3025_v35 = vunpack.i.l.bf16 %v3024_v30 }
 0xe21   : > { %2637 = vmatprep.mubr.msk.f32.mxu0 %vm449_vm0, %v1953_v48  ;;  %v2108_v56 = vsel %vm2106_vm4, %v2105_v3, %v3021_v41  ;;  %v2107_v36 = vsel %vm2106_vm4, %v2104_v32, %v3020_v59  ;;  %v3030_v40 = vunpack.i.l.bf16 %v3029_v57 }
 0xe22   : > { %v3100_v49 = vpop.eup %3099  ;;  %v2111_v37 = vsel %vm2109_vm5, %v2108_v56, %v3026_v34  ;;  %v2110_v38 = vsel %vm2109_vm5, %v2107_v36, %v3025_v35 }
 0xe23   : > { %v1954_v53 = vmul.f32 %v3100_v49, %v3096_v33  ;;  %v2113_v42 = vsel %vm2112_vm6, %v2110_v38, %v3030_v40  ;;  %v2114_v43 = vsel %vm2112_vm6, %v2111_v37, %v3031_v39  ;;  %v2385_v49 = vld [vmem:[%s3806_s3] ss:$0 sm:$0xff] }
 0xe25   : > { %2638 = vmatmul.mubr.msk.f32.vlgmr.msra.gmra.mrb[14].mxu0 %vm449_vm0, %v1954_v53 }
 0xe26   : > { %2822 = vmatpush3.bf16.msra.mxu0 %v2819_v46 }
 0xe27   : > { %2824 = vmatprep.subr.bf16.mxu0 %v2823_v61 }
 0xe2a   : > { %2826 = vmatpush3.bf16.msra.mxu0 %v2823_v61 }
 0xe2b   : > { %2828 = vmatprep.subr.bf16.mxu0 %v2827_v52 }
 0xe2e   : > { %2830 = vmatpush3.bf16.msra.mxu0 %v2827_v52 }
 0xe2f   : > { %2832 = vmatprep.subr.bf16.mxu0 %v2831_v0 }
 0xe32   : > { %2834 = vmatpush3.bf16.msra.mxu0 %v2831_v0 }
 0xe33   : > { %2836 = vmatprep.subr.bf16.mxu0 %v2835_v4 }
 0xe36   : > { %2838 = vmatpush3.bf16.msra.mxu0 %v2835_v4 }
 0xe37   : > { %2840 = vmatprep.subr.bf16.mxu0 %v2839_v8 }
 0xe3a   : > { %2842 = vmatpush3.bf16.msra.mxu0 %v2839_v8 }
 0xe3b   : > { %2844 = vmatprep.subr.bf16.mxu0 %v2843_v60 }
 0xe3e   : > { %2846 = vmatpush3.bf16.msra.mxu0 %v2843_v60 }
 0xe3f   : > { %2848 = vmatprep.subr.bf16.mxu0 %v2847_v13 }
 0xe42   : > { %2850 = vmatpush3.bf16.msra.mxu0 %v2847_v13 }
 0xef8   : > { %v2639_v14 = vpop.f32.mrb[14].mxu0 }
 0xef9   : > { %v2033_v15 = vpop.f32.mrb[15].mxu0 }
 0xefa   : > { %v3032_v16 = vpack.i.bf16 %v2639_v14, %v2033_v15 }
 0xefc   : > { %3033 = vrot.lane.b32.xlu0 %v3032_v16, %s3268_s23  ;;  %s3191_s23 = sshll.u32 %s3274_s19, 4  ;;  %s3192_s23 = int_to_ptr.vmem [resolvable:$false] %s3191_s23 }
 0xefd   : > { %s3193_s7 = scalar_lea.vmem %s3192_s23, 512  ;;  %p3194_p5 = scmp.lt.s32.totalorder %s3754_s27, %s3192_s23 }
 0xefe   : > { %p3195_p9 = scmp.lt.s32.totalorder %s3193_s7, %s3187_s21 }
 0xf00   : > { %p3196_p12 = por %p3195_p9, %p3194_p5 }
 0xf02   : > { %p3197_p2 = pnand %p3196_p12, %p3190_p3 }
 0xf6e   : > { %v3034_v31 = vpop.permute.xlu0 %3033 }
 0xf6f   : > { %v3036_v33 = vunpack.i.h.bf16 %v3034_v31  ;;  %v3035_v58 = vunpack.i.l.bf16 %v3034_v31 }
 0xf71   : > { %v2116_v47 = vsel %vm2115_vm7, %v2113_v42, %v3035_v58  ;;  %v2117_v48 = vsel %vm2115_vm7, %v2114_v43, %v3036_v33 }
 0xf72   : > { %2672 = vmatprep.mubr.f32.mxu0 %v2116_v47 }
 0xf73   : > { %2673 = vmatmul.mubr.f32.vlgmr.msra.gmra.mrb[16].mxu0 %v2117_v48 }
0x1046   : > { %v2674_v53 = vpop.f32.mrb[16].mxu0 }
0x1047   : > { %v2213_v54 = vadd.f32 %v2674_v53, %v2385_v49  ;;  %v2207_v44 = vpop.f32.mrb[17].mxu0 }
0x1048   : > { %v2208_v45 = vadd.f32 %v2385_v49, %v2207_v44 }
0x1049   : > { %2217 = vst [vmem:[%s244_s28 + $0x8] sm:$0xff] %v2213_v54 }
0x104a   : > { %2216 = vst [vmem:[%s244_s28] sm:$0xff] %v2208_v45 }
0x104b   : > { %3200 = shalt.err (!%p3197_p2)
}
0x104c   : > { %s3201_s8 = scalar_lea.hbm %s3759_s25, 256  ;;  %s3205_s9 = scalar_lea.hbm %s3807_s4, 512 }
0x104d   : > { %p3202_p13 = scmp.ne.s32.totalorder %s3759_s25, %s3201_s8  ;;  %p3206_p4 = scmp.lt.u32.totalorder %s3759_s25, %s3807_s4 }
0x104e   : > { %p3207_p7 = scmp.lt.u32.totalorder %s3205_s9, %s3201_s8  ;;  %p3209_p11 = scmp.lt.u32.totalorder %s3201_s8, %s3759_s25 }
0x104f   : > { %p3203_p6 = pnand %p3202_p13, %p3823_p0 }
0x1050   : > { %p3208_p8 = por %p3207_p7, %p3206_p4 }
0x1051   : > { %p3204_p10 = pneg %p3203_p6 }
0x1052   : > { %p3210_p1 = por %p3209_p11, %p3208_p8 }
0x1054   : > { %p3211_p3 = pnand %p3210_p1, %p3204_p10 }
0x1056   : > { %3214 = shalt.err (!%p3211_p3)
}
0x1057   : > { %s3275_s29 = smov 128   ;;  %s3276_s5 = smov 8  }
0x1058   : > { %2861 = dma.vmem_to_hbm [thread:$0]  (%p3823_p0), %s3754_s27, 256, %s3759_s25, %s2219_s13, %s3275_s29, %s3275_s29, %s3276_s5  }
0x1059 PF: > { %s2247_s12 = sand.u32 1, %s3245_s15   ;;  %p3824_p5 = scmp.ne.s32.totalorder %s3812_s22, 0 }
0x105a   : > { %p3825_p9 = scmp.ge.s32.totalorder %s3257_s18, 2  ;;  %s2248_s24 = scalar_lea.sflag [#allocation4], %s2247_s12 }
0x105c   : > { %p2875_p12 = pnand %p3825_p9, %p3824_p5 }
0x105e   : > { %3240 = dma.done.wait (!%p2875_p12), %s2248_s24, 256  }
0x105f   : > { %3242 = vsyncadd (!%p2875_p12), %s2248_s24, 4294967040  ;;  %p18_p2 = scmp.ge.s32.totalorder %s3415_s11, 4   ;;  %s3826_s15 = smov %s3249_s16 }
0x1060   : > { %s3827_s16 = smov %s3253_s17  ;;  %s3828_s17 = smov %s3424_s14 }
0x1061   : > { %s3829_s18 = smov %s3415_s11  ;;  %20 = sbr.rel (!%p18_p2) target bundleno = 6 (0x6), region = 89 }
0x1068   :  { %2253 = vsyncpa [#allocation3], 1 }
0x1069   :  { %2255 = vsyncpa [#allocation3 + $0x1], 1 }
0x106a   :  { %2256 = vsyncpa [#allocation6], 1 }
0x106b   :  { %2257 = vsyncpa [#allocation4], 1 }
0x106c   :  { %2259 = vsyncpa [#allocation4 + $0x1], 1 }

</bundles_post_ra>
